<compile_context>
chip_gen: v7x
topology: tpu7x:2x2x1
jax: 0.10.0
libtpu: 0.0.40
codegen_flags: <defaults>
</compile_context>

<pallas_src>
import math

import jax
import jax.numpy as jnp
from jax.experimental import pallas as pl
from jax.experimental.pallas import tpu as pltpu

# ----------------------------- problem sizes ------------------------------
B = 2            # batch
N = 8            # sequence length
DIM = 32         # embedding dim (C)
NUM_HEADS = 4    # heads (DIM % NUM_HEADS == 0)
HEAD_DIM = DIM // NUM_HEADS
MLP_RATIO = 4.0
HIDDEN = int(DIM * MLP_RATIO)   # 128
SCALE = HEAD_DIM ** (-0.5)
LN_EPS = 1e-5

_SQRT_2_OVER_PI = math.sqrt(2.0 / math.pi)


# ----------------------------- in-kernel math ------------------------------
def _gelu_tanh(x):
    # tanh-approximate GELU: tanh lowers to the EUP (idle slot here), avoiding
    # the ~14-op VALU polynomial of a rational erf.  Max abs deviation from
    # the exact (erf) GELU is ~3e-4, well inside the 2e-3 check tolerance.
    x3 = x * x * x
    return 0.5 * x * (1.0 + jnp.tanh(_SQRT_2_OVER_PI * (x + 0.044715 * x3)))


def _layernorm(y, w, b):
    mu = jnp.mean(y, axis=-1, keepdims=True)
    var = jnp.mean(jnp.square(y - mu), axis=-1, keepdims=True)
    return (y - mu) * jax.lax.rsqrt(var + LN_EPS) * w + b


# ------------------------------- the kernel --------------------------------
def encoder_kernel(
    x_ref,                                           # (B*N, DIM)
    # attention params
    ln1a_w, ln1a_b, wqkv, ln2a_w, ln2a_b, wproj, bproj,
    # mlp params
    ln1m_w, ln1m_b, wfc1, bfc1, ln2m_w, ln2m_b, wfc2, bfc2,
    # output
    out_ref,                                         # (B*N, DIM)
):
    x = x_ref[...]                                   # (B*N, C) f32

    # ---------------- Attention branch ----------------
    xa = _layernorm(x, ln1a_w[...], ln1a_b[...])
    # fused q/k/v projection: one MXU op instead of three
    qkv = jnp.dot(xa, wqkv[...], preferred_element_type=jnp.float32)  # (B*N, 3C)
    q = qkv[:, :DIM]
    k = qkv[:, DIM:2 * DIM]
    v = qkv[:, 2 * DIM:]

    # Per-(batch, head) attention.  Heads are contiguous HEAD_DIM-wide column
    # chunks (matches the PyTorch reshape + permute).  Everything stays in
    # registers; results are concatenated instead of round-tripping via VMEM.
    per_batch = []
    for b in range(B):
        rows = slice(b * N, (b + 1) * N)
        heads = []
        for h in range(NUM_HEADS):
            cols = slice(h * HEAD_DIM, (h + 1) * HEAD_DIM)
            qh = q[rows, cols]
            kh = k[rows, cols]
            vh = v[rows, cols]
            s = jnp.dot(qh, kh.T, preferred_element_type=jnp.float32) * SCALE
            s = s - jnp.max(s, axis=-1, keepdims=True)
            p = jnp.exp(s)
            denom = jnp.sum(p, axis=-1, keepdims=True)
            # one reciprocal per row instead of a full vector divide
            p = p * pl.reciprocal(denom, approx=False)
            heads.append(jnp.dot(p, vh, preferred_element_type=jnp.float32))
        per_batch.append(jnp.concatenate(heads, axis=-1))       # (N, C)
    attn_out = jnp.concatenate(per_batch, axis=0)               # (B*N, C)

    attn_out = _layernorm(attn_out, ln2a_w[...], ln2a_b[...])
    attn_out = jnp.dot(attn_out, wproj[...],
                       preferred_element_type=jnp.float32) + bproj[...]
    x1 = x + attn_out                                           # residual 1

    # ------------------- MLP branch --------------------
    xm = _layernorm(x1, ln1m_w[...], ln1m_b[...])
    h1 = jnp.dot(xm, wfc1[...], preferred_element_type=jnp.float32) + bfc1[...]
    h1 = _gelu_tanh(h1)
    h1 = _layernorm(h1, ln2m_w[...], ln2m_b[...])
    h2 = jnp.dot(h1, wfc2[...], preferred_element_type=jnp.float32) + bfc2[...]

    out_ref[...] = x1 + h2                                      # residual 2


# ------------------------------- the wrapper --------------------------------
def encoder_forward(x, params):
    """x: (B, N, C) f32.  params: dict of weights already in
    (in_features, out_features) layout for in-kernel `x @ W`."""
    # fuse q/k/v weights into one (DIM, 3*DIM) matrix
    wqkv = jnp.concatenate([params["wq"], params["wk"], params["wv"]], axis=1)
    plist = [
        params["ln1a_w"], params["ln1a_b"], wqkv,
        params["ln2a_w"], params["ln2a_b"], params["wproj"], params["bproj"],
        params["ln1m_w"], params["ln1m_b"], params["wfc1"], params["bfc1"],
        params["ln2m_w"], params["ln2m_b"], params["wfc2"], params["bfc2"],
    ]

    # flatten tokens: (B, N, C) -> (B*N, C); the whole batch is one grid step.
    x2 = x.reshape(B * N, DIM)

    def full_spec(arr):
        nd = arr.ndim
        return pl.BlockSpec(arr.shape, lambda i, _n=nd: (0,) * _n)

    grid_spec = pltpu.PrefetchScalarGridSpec(
        num_scalar_prefetch=0,
        grid=(1,),                                    # single step: no per-step overhead x B
        in_specs=[full_spec(x2)] + [full_spec(p) for p in plist],
        out_specs=pl.BlockSpec((B * N, DIM), lambda i: (0, 0)),
    )

    out = pl.pallas_call(
        encoder_kernel,
        out_shape=jax.ShapeDtypeStruct((B * N, DIM), jnp.float32),
        grid_spec=grid_spec,
        compiler_params=pltpu.CompilerParams(
            dimension_semantics=("arbitrary",)),
    )(x2, *plist)
    return out.reshape(B, N, DIM)


# ----------------------- deterministic parameter init -----------------------
def init_params(key):
    def xavier(key, fan_in, fan_out):
        std = math.sqrt(2.0 / (fan_in + fan_out))
        return jax.random.normal(key, (fan_in, fan_out), jnp.float32) * std

    keys = jax.random.split(key, 8)
    p = {
        # attention
        "ln1a_w": jnp.ones((1, DIM), jnp.float32),
        "ln1a_b": jnp.zeros((1, DIM), jnp.float32),
        "wq": xavier(keys[0], DIM, DIM),
        "wk": xavier(keys[1], DIM, DIM),
        "wv": xavier(keys[2], DIM, DIM),
        "ln2a_w": jnp.ones((1, DIM), jnp.float32),
        "ln2a_b": jnp.zeros((1, DIM), jnp.float32),
        "wproj": xavier(keys[3], DIM, DIM),
        "bproj": jax.random.normal(keys[4], (1, DIM), jnp.float32) * 0.02,
        # mlp
        "ln1m_w": jnp.ones((1, DIM), jnp.float32),
        "ln1m_b": jnp.zeros((1, DIM), jnp.float32),
        "wfc1": xavier(keys[5], DIM, HIDDEN),
        "bfc1": jnp.zeros((1, HIDDEN), jnp.float32),
        "ln2m_w": jnp.ones((1, HIDDEN), jnp.float32),
        "ln2m_b": jnp.zeros((1, HIDDEN), jnp.float32),
        "wfc2": xavier(keys[6], HIDDEN, DIM),
        "bfc2": jnp.zeros((1, DIM), jnp.float32),
    }
    return p


# ----------------------------- pure-JAX reference ----------------------------
def reference_forward(x, p):
    hp = jax.lax.Precision.HIGHEST

    def ln(y, w, b):
        mu = y.mean(-1, keepdims=True)
        var = jnp.square(y - mu).mean(-1, keepdims=True)
        return (y - mu) / jnp.sqrt(var + LN_EPS) * w + b

    # attention (follows the PyTorch reshape/permute exactly)
    xa = ln(x, p["ln1a_w"], p["ln1a_b"])
    q = jnp.einsum("bnc,cd->bnd", xa, p["wq"], precision=hp)
    k = jnp.einsum("bnc,cd->bnd", xa, p["wk"], precision=hp)
    v = jnp.einsum("bnc,cd->bnd", xa, p["wv"], precision=hp)
    q = q.reshape(B, N, NUM_HEADS, HEAD_DIM).transpose(0, 2, 1, 3)
    k = k.reshape(B, N, NUM_HEADS, HEAD_DIM).transpose(0, 2, 1, 3)
    v = v.reshape(B, N, NUM_HEADS, HEAD_DIM).transpose(0, 2, 1, 3)
    attn = jnp.einsum("bhnd,bhmd->bhnm", q, k, precision=hp) * SCALE
    attn = jax.nn.softmax(attn, axis=-1)
    o = jnp.einsum("bhnm,bhmd->bhnd", attn, v, precision=hp)
    o = o.transpose(0, 2, 1, 3).reshape(B, N, DIM)
    o = ln(o, p["ln2a_w"], p["ln2a_b"])
    o = jnp.einsum("bnc,cd->bnd", o, p["wproj"], precision=hp) + p["bproj"]
    x1 = x + o

    # mlp
    m = ln(x1, p["ln1m_w"], p["ln1m_b"])
    m = jnp.einsum("bnc,ch->bnh", m, p["wfc1"], precision=hp) + p["bfc1"]
    m = jax.nn.gelu(m, approximate=False)
    m = ln(m, p["ln2m_w"], p["ln2m_b"])
    m = jnp.einsum("bnh,hc->bnc", m, p["wfc2"], precision=hp) + p["bfc2"]
    return x1 + m


# ----------------------------------- main ------------------------------------
if __name__ == "__main__":
    key = jax.random.PRNGKey(0)
    kx, kp = jax.random.split(key)
    x = jax.random.normal(kx, (B, N, DIM), jnp.float32)
    params = init_params(kp)

    out = jax.block_until_ready(encoder_forward(x, params))
    ref = jax.block_until_ready(reference_forward(x, params))

    assert out.shape == (B, N, DIM)
    assert jnp.all(jnp.isfinite(out))
    if not jnp.allclose(out, ref, atol=2e-3, rtol=2e-3):
        raise AssertionError(
            f"mismatch: max abs err = {float(jnp.max(jnp.abs(out - ref)))}")

    print("KERNEL_OK")
</pallas_src>

<mosaic_0001>
module attributes {stable_mosaic.version = 11 : i64} {
  func.func @encoder_kernel(%arg0: i32, %arg1: memref<16x32xf32, #tpu.memory_space<vmem>>, %arg2: memref<1x32xf32, #tpu.memory_space<vmem>>, %arg3: memref<1x32xf32, #tpu.memory_space<vmem>>, %arg4: memref<32x96xf32, #tpu.memory_space<vmem>>, %arg5: memref<1x32xf32, #tpu.memory_space<vmem>>, %arg6: memref<1x32xf32, #tpu.memory_space<vmem>>, %arg7: memref<32x32xf32, #tpu.memory_space<vmem>>, %arg8: memref<1x32xf32, #tpu.memory_space<vmem>>, %arg9: memref<1x32xf32, #tpu.memory_space<vmem>>, %arg10: memref<1x32xf32, #tpu.memory_space<vmem>>, %arg11: memref<32x128xf32, #tpu.memory_space<vmem>>, %arg12: memref<1x128xf32, #tpu.memory_space<vmem>>, %arg13: memref<1x128xf32, #tpu.memory_space<vmem>>, %arg14: memref<1x128xf32, #tpu.memory_space<vmem>>, %arg15: memref<128x32xf32, #tpu.memory_space<vmem>>, %arg16: memref<1x32xf32, #tpu.memory_space<vmem>>, %arg17: memref<16x32xf32, #tpu.memory_space<vmem>>) attributes {dimension_semantics = [#tpu.dimension_semantics<arbitrary>], iteration_bounds = array<i64: 1>, scalar_prefetch = 0 : i64, scratch_operands = 0 : i64, tpu.core_type = #tpu.core_type<tc>, window_params = [{pipeline_mode = #tpu.pipeline_mode<synchronous>, transform_indices = @transform_0, window_bounds = array<i64: 16, 32>}, {pipeline_mode = #tpu.pipeline_mode<synchronous>, transform_indices = @transform_1, window_bounds = array<i64: 1, 32>}, {pipeline_mode = #tpu.pipeline_mode<synchronous>, transform_indices = @transform_2, window_bounds = array<i64: 1, 32>}, {pipeline_mode = #tpu.pipeline_mode<synchronous>, transform_indices = @transform_3, window_bounds = array<i64: 32, 96>}, {pipeline_mode = #tpu.pipeline_mode<synchronous>, transform_indices = @transform_4, window_bounds = array<i64: 1, 32>}, {pipeline_mode = #tpu.pipeline_mode<synchronous>, transform_indices = @transform_5, window_bounds = array<i64: 1, 32>}, {pipeline_mode = #tpu.pipeline_mode<synchronous>, transform_indices = @transform_6, window_bounds = array<i64: 32, 32>}, {pipeline_mode = #tpu.pipeline_mode<synchronous>, transform_indices = @transform_7, window_bounds = array<i64: 1, 32>}, {pipeline_mode = #tpu.pipeline_mode<synchronous>, transform_indices = @transform_8, window_bounds = array<i64: 1, 32>}, {pipeline_mode = #tpu.pipeline_mode<synchronous>, transform_indices = @transform_9, window_bounds = array<i64: 1, 32>}, {pipeline_mode = #tpu.pipeline_mode<synchronous>, transform_indices = @transform_10, window_bounds = array<i64: 32, 128>}, {pipeline_mode = #tpu.pipeline_mode<synchronous>, transform_indices = @transform_11, window_bounds = array<i64: 1, 128>}, {pipeline_mode = #tpu.pipeline_mode<synchronous>, transform_indices = @transform_12, window_bounds = array<i64: 1, 128>}, {pipeline_mode = #tpu.pipeline_mode<synchronous>, transform_indices = @transform_13, window_bounds = array<i64: 1, 128>}, {pipeline_mode = #tpu.pipeline_mode<synchronous>, transform_indices = @transform_14, window_bounds = array<i64: 128, 32>}, {pipeline_mode = #tpu.pipeline_mode<synchronous>, transform_indices = @transform_15, window_bounds = array<i64: 1, 32>}, {pipeline_mode = #tpu.pipeline_mode<synchronous>, transform_indices = @transform_16, window_bounds = array<i64: 16, 32>}]} {
    %c0 = arith.constant 0 : index
    %c0_0 = arith.constant 0 : index
    %0 = vector.load %arg1[%c0, %c0_0] : memref<16x32xf32, #tpu.memory_space<vmem>>, vector<16x32xf32>
    %c0_1 = arith.constant 0 : index
    %c0_2 = arith.constant 0 : index
    %1 = vector.load %arg2[%c0_1, %c0_2] : memref<1x32xf32, #tpu.memory_space<vmem>>, vector<1x32xf32>
    %c0_3 = arith.constant 0 : index
    %c0_4 = arith.constant 0 : index
    %2 = vector.load %arg3[%c0_3, %c0_4] : memref<1x32xf32, #tpu.memory_space<vmem>>, vector<1x32xf32>
    %cst = arith.constant dense<0.000000e+00> : vector<16xf32>
    %3 = vector.multi_reduction <add>, %0, %cst [1] : vector<16x32xf32> to vector<16xf32>
    %4 = vector.shape_cast %3 : vector<16xf32> to vector<16x1xf32>
    %cst_5 = arith.constant 3.200000e+01 : f32
    %5 = vector.broadcast %cst_5 : f32 to vector<16x1xf32>
    %6 = arith.divf %4, %5 : vector<16x1xf32>
    %7 = vector.broadcast %6 : vector<16x1xf32> to vector<16x32xf32>
    %8 = arith.subf %0, %7 : vector<16x32xf32>
    %9 = arith.mulf %8, %8 : vector<16x32xf32>
    %cst_6 = arith.constant dense<0.000000e+00> : vector<16xf32>
    %10 = vector.multi_reduction <add>, %9, %cst_6 [1] : vector<16x32xf32> to vector<16xf32>
    %11 = vector.shape_cast %10 : vector<16xf32> to vector<16x1xf32>
    %cst_7 = arith.constant 3.200000e+01 : f32
    %12 = vector.broadcast %cst_7 : f32 to vector<16x1xf32>
    %13 = arith.divf %11, %12 : vector<16x1xf32>
    %14 = vector.broadcast %6 : vector<16x1xf32> to vector<16x32xf32>
    %15 = arith.subf %0, %14 : vector<16x32xf32>
    %cst_8 = arith.constant 9.99999974E-6 : f32
    %16 = vector.broadcast %cst_8 : f32 to vector<16x1xf32>
    %17 = arith.addf %13, %16 : vector<16x1xf32>
    %18 = math.rsqrt %17 : vector<16x1xf32>
    %19 = vector.broadcast %18 : vector<16x1xf32> to vector<16x32xf32>
    %20 = arith.mulf %15, %19 : vector<16x32xf32>
    %21 = vector.broadcast %1 : vector<1x32xf32> to vector<16x32xf32>
    %22 = arith.mulf %20, %21 : vector<16x32xf32>
    %23 = vector.broadcast %2 : vector<1x32xf32> to vector<16x32xf32>
    %24 = arith.addf %22, %23 : vector<16x32xf32>
    %c0_9 = arith.constant 0 : index
    %c0_10 = arith.constant 0 : index
    %25 = vector.load %arg4[%c0_9, %c0_10] : memref<32x96xf32, #tpu.memory_space<vmem>>, vector<32x96xf32>
    %cst_11 = arith.constant dense<0.000000e+00> : vector<16x96xf32>
    %26 = tpu.matmul %24, %25, %cst_11 {dimension_numbers = #tpu.dot_dimension_numbers<[1], [0], [0], [1], [0, 0, 1, 1], [], []>} : vector<16x32xf32>, vector<32x96xf32>, vector<16x96xf32> -> vector<16x96xf32>
    %27 = vector.extract_strided_slice %26 {offsets = [0, 0], sizes = [16, 32], strides = [1, 1]} : vector<16x96xf32> to vector<16x32xf32>
    %28 = vector.extract_strided_slice %26 {offsets = [0, 32], sizes = [16, 32], strides = [1, 1]} : vector<16x96xf32> to vector<16x32xf32>
    %29 = vector.extract_strided_slice %26 {offsets = [0, 64], sizes = [16, 32], strides = [1, 1]} : vector<16x96xf32> to vector<16x32xf32>
    %30 = vector.extract_strided_slice %27 {offsets = [0, 0], sizes = [8, 8], strides = [1, 1]} : vector<16x32xf32> to vector<8x8xf32>
    %31 = vector.extract_strided_slice %28 {offsets = [0, 0], sizes = [8, 8], strides = [1, 1]} : vector<16x32xf32> to vector<8x8xf32>
    %32 = vector.extract_strided_slice %29 {offsets = [0, 0], sizes = [8, 8], strides = [1, 1]} : vector<16x32xf32> to vector<8x8xf32>
    %33 = tpu.transpose %31, [1, 0] : vector<8x8xf32> -> vector<8x8xf32>
    %cst_12 = arith.constant dense<0.000000e+00> : vector<8x8xf32>
    %34 = tpu.matmul %30, %33, %cst_12 {dimension_numbers = #tpu.dot_dimension_numbers<[1], [0], [0], [1], [0, 0, 1, 1], [], []>} : vector<8x8xf32>, vector<8x8xf32>, vector<8x8xf32> -> vector<8x8xf32>
    %cst_13 = arith.constant 0.353553385 : f32
    %35 = vector.broadcast %cst_13 : f32 to vector<8x8xf32>
    %36 = arith.mulf %34, %35 : vector<8x8xf32>
    %cst_14 = arith.constant dense<0xFF800000> : vector<8xf32>
    %37 = vector.multi_reduction <maximumf>, %36, %cst_14 [1] : vector<8x8xf32> to vector<8xf32>
    %38 = vector.shape_cast %37 : vector<8xf32> to vector<8x1xf32>
    %39 = vector.broadcast %38 : vector<8x1xf32> to vector<8x8xf32>
    %40 = arith.subf %36, %39 : vector<8x8xf32>
    %41 = math.exp %40 : vector<8x8xf32>
    %cst_15 = arith.constant dense<0.000000e+00> : vector<8xf32>
    %42 = vector.multi_reduction <add>, %41, %cst_15 [1] : vector<8x8xf32> to vector<8xf32>
    %43 = vector.shape_cast %42 : vector<8xf32> to vector<8x1xf32>
    %44 = tpu.reciprocal %43 : vector<8x1xf32> -> vector<8x1xf32>
    %45 = vector.broadcast %44 : vector<8x1xf32> to vector<8x8xf32>
    %46 = arith.mulf %41, %45 : vector<8x8xf32>
    %cst_16 = arith.constant dense<0.000000e+00> : vector<8x8xf32>
    %47 = tpu.matmul %46, %32, %cst_16 {dimension_numbers = #tpu.dot_dimension_numbers<[1], [0], [0], [1], [0, 0, 1, 1], [], []>} : vector<8x8xf32>, vector<8x8xf32>, vector<8x8xf32> -> vector<8x8xf32>
    %48 = vector.extract_strided_slice %27 {offsets = [0, 8], sizes = [8, 8], strides = [1, 1]} : vector<16x32xf32> to vector<8x8xf32>
    %49 = vector.extract_strided_slice %28 {offsets = [0, 8], sizes = [8, 8], strides = [1, 1]} : vector<16x32xf32> to vector<8x8xf32>
    %50 = vector.extract_strided_slice %29 {offsets = [0, 8], sizes = [8, 8], strides = [1, 1]} : vector<16x32xf32> to vector<8x8xf32>
    %51 = tpu.transpose %49, [1, 0] : vector<8x8xf32> -> vector<8x8xf32>
    %cst_17 = arith.constant dense<0.000000e+00> : vector<8x8xf32>
    %52 = tpu.matmul %48, %51, %cst_17 {dimension_numbers = #tpu.dot_dimension_numbers<[1], [0], [0], [1], [0, 0, 1, 1], [], []>} : vector<8x8xf32>, vector<8x8xf32>, vector<8x8xf32> -> vector<8x8xf32>
    %cst_18 = arith.constant 0.353553385 : f32
    %53 = vector.broadcast %cst_18 : f32 to vector<8x8xf32>
    %54 = arith.mulf %52, %53 : vector<8x8xf32>
    %cst_19 = arith.constant dense<0xFF800000> : vector<8xf32>
    %55 = vector.multi_reduction <maximumf>, %54, %cst_19 [1] : vector<8x8xf32> to vector<8xf32>
    %56 = vector.shape_cast %55 : vector<8xf32> to vector<8x1xf32>
    %57 = vector.broadcast %56 : vector<8x1xf32> to vector<8x8xf32>
    %58 = arith.subf %54, %57 : vector<8x8xf32>
    %59 = math.exp %58 : vector<8x8xf32>
    %cst_20 = arith.constant dense<0.000000e+00> : vector<8xf32>
    %60 = vector.multi_reduction <add>, %59, %cst_20 [1] : vector<8x8xf32> to vector<8xf32>
    %61 = vector.shape_cast %60 : vector<8xf32> to vector<8x1xf32>
    %62 = tpu.reciprocal %61 : vector<8x1xf32> -> vector<8x1xf32>
    %63 = vector.broadcast %62 : vector<8x1xf32> to vector<8x8xf32>
    %64 = arith.mulf %59, %63 : vector<8x8xf32>
    %cst_21 = arith.constant dense<0.000000e+00> : vector<8x8xf32>
    %65 = tpu.matmul %64, %50, %cst_21 {dimension_numbers = #tpu.dot_dimension_numbers<[1], [0], [0], [1], [0, 0, 1, 1], [], []>} : vector<8x8xf32>, vector<8x8xf32>, vector<8x8xf32> -> vector<8x8xf32>
    %66 = vector.extract_strided_slice %27 {offsets = [0, 16], sizes = [8, 8], strides = [1, 1]} : vector<16x32xf32> to vector<8x8xf32>
    %67 = vector.extract_strided_slice %28 {offsets = [0, 16], sizes = [8, 8], strides = [1, 1]} : vector<16x32xf32> to vector<8x8xf32>
    %68 = vector.extract_strided_slice %29 {offsets = [0, 16], sizes = [8, 8], strides = [1, 1]} : vector<16x32xf32> to vector<8x8xf32>
    %69 = tpu.transpose %67, [1, 0] : vector<8x8xf32> -> vector<8x8xf32>
    %cst_22 = arith.constant dense<0.000000e+00> : vector<8x8xf32>
    %70 = tpu.matmul %66, %69, %cst_22 {dimension_numbers = #tpu.dot_dimension_numbers<[1], [0], [0], [1], [0, 0, 1, 1], [], []>} : vector<8x8xf32>, vector<8x8xf32>, vector<8x8xf32> -> vector<8x8xf32>
    %cst_23 = arith.constant 0.353553385 : f32
    %71 = vector.broadcast %cst_23 : f32 to vector<8x8xf32>
    %72 = arith.mulf %70, %71 : vector<8x8xf32>
    %cst_24 = arith.constant dense<0xFF800000> : vector<8xf32>
    %73 = vector.multi_reduction <maximumf>, %72, %cst_24 [1] : vector<8x8xf32> to vector<8xf32>
    %74 = vector.shape_cast %73 : vector<8xf32> to vector<8x1xf32>
    %75 = vector.broadcast %74 : vector<8x1xf32> to vector<8x8xf32>
    %76 = arith.subf %72, %75 : vector<8x8xf32>
    %77 = math.exp %76 : vector<8x8xf32>
    %cst_25 = arith.constant dense<0.000000e+00> : vector<8xf32>
    %78 = vector.multi_reduction <add>, %77, %cst_25 [1] : vector<8x8xf32> to vector<8xf32>
    %79 = vector.shape_cast %78 : vector<8xf32> to vector<8x1xf32>
    %80 = tpu.reciprocal %79 : vector<8x1xf32> -> vector<8x1xf32>
    %81 = vector.broadcast %80 : vector<8x1xf32> to vector<8x8xf32>
    %82 = arith.mulf %77, %81 : vector<8x8xf32>
    %cst_26 = arith.constant dense<0.000000e+00> : vector<8x8xf32>
    %83 = tpu.matmul %82, %68, %cst_26 {dimension_numbers = #tpu.dot_dimension_numbers<[1], [0], [0], [1], [0, 0, 1, 1], [], []>} : vector<8x8xf32>, vector<8x8xf32>, vector<8x8xf32> -> vector<8x8xf32>
    %84 = vector.extract_strided_slice %27 {offsets = [0, 24], sizes = [8, 8], strides = [1, 1]} : vector<16x32xf32> to vector<8x8xf32>
    %85 = vector.extract_strided_slice %28 {offsets = [0, 24], sizes = [8, 8], strides = [1, 1]} : vector<16x32xf32> to vector<8x8xf32>
    %86 = vector.extract_strided_slice %29 {offsets = [0, 24], sizes = [8, 8], strides = [1, 1]} : vector<16x32xf32> to vector<8x8xf32>
    %87 = tpu.transpose %85, [1, 0] : vector<8x8xf32> -> vector<8x8xf32>
    %cst_27 = arith.constant dense<0.000000e+00> : vector<8x8xf32>
    %88 = tpu.matmul %84, %87, %cst_27 {dimension_numbers = #tpu.dot_dimension_numbers<[1], [0], [0], [1], [0, 0, 1, 1], [], []>} : vector<8x8xf32>, vector<8x8xf32>, vector<8x8xf32> -> vector<8x8xf32>
    %cst_28 = arith.constant 0.353553385 : f32
    %89 = vector.broadcast %cst_28 : f32 to vector<8x8xf32>
    %90 = arith.mulf %88, %89 : vector<8x8xf32>
    %cst_29 = arith.constant dense<0xFF800000> : vector<8xf32>
    %91 = vector.multi_reduction <maximumf>, %90, %cst_29 [1] : vector<8x8xf32> to vector<8xf32>
    %92 = vector.shape_cast %91 : vector<8xf32> to vector<8x1xf32>
    %93 = vector.broadcast %92 : vector<8x1xf32> to vector<8x8xf32>
    %94 = arith.subf %90, %93 : vector<8x8xf32>
    %95 = math.exp %94 : vector<8x8xf32>
    %cst_30 = arith.constant dense<0.000000e+00> : vector<8xf32>
    %96 = vector.multi_reduction <add>, %95, %cst_30 [1] : vector<8x8xf32> to vector<8xf32>
    %97 = vector.shape_cast %96 : vector<8xf32> to vector<8x1xf32>
    %98 = tpu.reciprocal %97 : vector<8x1xf32> -> vector<8x1xf32>
    %99 = vector.broadcast %98 : vector<8x1xf32> to vector<8x8xf32>
    %100 = arith.mulf %95, %99 : vector<8x8xf32>
    %cst_31 = arith.constant dense<0.000000e+00> : vector<8x8xf32>
    %101 = tpu.matmul %100, %86, %cst_31 {dimension_numbers = #tpu.dot_dimension_numbers<[1], [0], [0], [1], [0, 0, 1, 1], [], []>} : vector<8x8xf32>, vector<8x8xf32>, vector<8x8xf32> -> vector<8x8xf32>
    %102 = tpu.concatenate %47, %65, %83, %101 in 1 : vector<8x8xf32>, vector<8x8xf32>, vector<8x8xf32>, vector<8x8xf32> -> vector<8x32xf32>
    %103 = vector.extract_strided_slice %27 {offsets = [8, 0], sizes = [8, 8], strides = [1, 1]} : vector<16x32xf32> to vector<8x8xf32>
    %104 = vector.extract_strided_slice %28 {offsets = [8, 0], sizes = [8, 8], strides = [1, 1]} : vector<16x32xf32> to vector<8x8xf32>
    %105 = vector.extract_strided_slice %29 {offsets = [8, 0], sizes = [8, 8], strides = [1, 1]} : vector<16x32xf32> to vector<8x8xf32>
    %106 = tpu.transpose %104, [1, 0] : vector<8x8xf32> -> vector<8x8xf32>
    %cst_32 = arith.constant dense<0.000000e+00> : vector<8x8xf32>
    %107 = tpu.matmul %103, %106, %cst_32 {dimension_numbers = #tpu.dot_dimension_numbers<[1], [0], [0], [1], [0, 0, 1, 1], [], []>} : vector<8x8xf32>, vector<8x8xf32>, vector<8x8xf32> -> vector<8x8xf32>
    %cst_33 = arith.constant 0.353553385 : f32
    %108 = vector.broadcast %cst_33 : f32 to vector<8x8xf32>
    %109 = arith.mulf %107, %108 : vector<8x8xf32>
    %cst_34 = arith.constant dense<0xFF800000> : vector<8xf32>
    %110 = vector.multi_reduction <maximumf>, %109, %cst_34 [1] : vector<8x8xf32> to vector<8xf32>
    %111 = vector.shape_cast %110 : vector<8xf32> to vector<8x1xf32>
    %112 = vector.broadcast %111 : vector<8x1xf32> to vector<8x8xf32>
    %113 = arith.subf %109, %112 : vector<8x8xf32>
    %114 = math.exp %113 : vector<8x8xf32>
    %cst_35 = arith.constant dense<0.000000e+00> : vector<8xf32>
    %115 = vector.multi_reduction <add>, %114, %cst_35 [1] : vector<8x8xf32> to vector<8xf32>
    %116 = vector.shape_cast %115 : vector<8xf32> to vector<8x1xf32>
    %117 = tpu.reciprocal %116 : vector<8x1xf32> -> vector<8x1xf32>
    %118 = vector.broadcast %117 : vector<8x1xf32> to vector<8x8xf32>
    %119 = arith.mulf %114, %118 : vector<8x8xf32>
    %cst_36 = arith.constant dense<0.000000e+00> : vector<8x8xf32>
    %120 = tpu.matmul %119, %105, %cst_36 {dimension_numbers = #tpu.dot_dimension_numbers<[1], [0], [0], [1], [0, 0, 1, 1], [], []>} : vector<8x8xf32>, vector<8x8xf32>, vector<8x8xf32> -> vector<8x8xf32>
    %121 = vector.extract_strided_slice %27 {offsets = [8, 8], sizes = [8, 8], strides = [1, 1]} : vector<16x32xf32> to vector<8x8xf32>
    %122 = vector.extract_strided_slice %28 {offsets = [8, 8], sizes = [8, 8], strides = [1, 1]} : vector<16x32xf32> to vector<8x8xf32>
    %123 = vector.extract_strided_slice %29 {offsets = [8, 8], sizes = [8, 8], strides = [1, 1]} : vector<16x32xf32> to vector<8x8xf32>
    %124 = tpu.transpose %122, [1, 0] : vector<8x8xf32> -> vector<8x8xf32>
    %cst_37 = arith.constant dense<0.000000e+00> : vector<8x8xf32>
    %125 = tpu.matmul %121, %124, %cst_37 {dimension_numbers = #tpu.dot_dimension_numbers<[1], [0], [0], [1], [0, 0, 1, 1], [], []>} : vector<8x8xf32>, vector<8x8xf32>, vector<8x8xf32> -> vector<8x8xf32>
    %cst_38 = arith.constant 0.353553385 : f32
    %126 = vector.broadcast %cst_38 : f32 to vector<8x8xf32>
    %127 = arith.mulf %125, %126 : vector<8x8xf32>
    %cst_39 = arith.constant dense<0xFF800000> : vector<8xf32>
    %128 = vector.multi_reduction <maximumf>, %127, %cst_39 [1] : vector<8x8xf32> to vector<8xf32>
    %129 = vector.shape_cast %128 : vector<8xf32> to vector<8x1xf32>
    %130 = vector.broadcast %129 : vector<8x1xf32> to vector<8x8xf32>
    %131 = arith.subf %127, %130 : vector<8x8xf32>
    %132 = math.exp %131 : vector<8x8xf32>
    %cst_40 = arith.constant dense<0.000000e+00> : vector<8xf32>
    %133 = vector.multi_reduction <add>, %132, %cst_40 [1] : vector<8x8xf32> to vector<8xf32>
    %134 = vector.shape_cast %133 : vector<8xf32> to vector<8x1xf32>
    %135 = tpu.reciprocal %134 : vector<8x1xf32> -> vector<8x1xf32>
    %136 = vector.broadcast %135 : vector<8x1xf32> to vector<8x8xf32>
    %137 = arith.mulf %132, %136 : vector<8x8xf32>
    %cst_41 = arith.constant dense<0.000000e+00> : vector<8x8xf32>
    %138 = tpu.matmul %137, %123, %cst_41 {dimension_numbers = #tpu.dot_dimension_numbers<[1], [0], [0], [1], [0, 0, 1, 1], [], []>} : vector<8x8xf32>, vector<8x8xf32>, vector<8x8xf32> -> vector<8x8xf32>
    %139 = vector.extract_strided_slice %27 {offsets = [8, 16], sizes = [8, 8], strides = [1, 1]} : vector<16x32xf32> to vector<8x8xf32>
    %140 = vector.extract_strided_slice %28 {offsets = [8, 16], sizes = [8, 8], strides = [1, 1]} : vector<16x32xf32> to vector<8x8xf32>
    %141 = vector.extract_strided_slice %29 {offsets = [8, 16], sizes = [8, 8], strides = [1, 1]} : vector<16x32xf32> to vector<8x8xf32>
    %142 = tpu.transpose %140, [1, 0] : vector<8x8xf32> -> vector<8x8xf32>
    %cst_42 = arith.constant dense<0.000000e+00> : vector<8x8xf32>
    %143 = tpu.matmul %139, %142, %cst_42 {dimension_numbers = #tpu.dot_dimension_numbers<[1], [0], [0], [1], [0, 0, 1, 1], [], []>} : vector<8x8xf32>, vector<8x8xf32>, vector<8x8xf32> -> vector<8x8xf32>
    %cst_43 = arith.constant 0.353553385 : f32
    %144 = vector.broadcast %cst_43 : f32 to vector<8x8xf32>
    %145 = arith.mulf %143, %144 : vector<8x8xf32>
    %cst_44 = arith.constant dense<0xFF800000> : vector<8xf32>
    %146 = vector.multi_reduction <maximumf>, %145, %cst_44 [1] : vector<8x8xf32> to vector<8xf32>
    %147 = vector.shape_cast %146 : vector<8xf32> to vector<8x1xf32>
    %148 = vector.broadcast %147 : vector<8x1xf32> to vector<8x8xf32>
    %149 = arith.subf %145, %148 : vector<8x8xf32>
    %150 = math.exp %149 : vector<8x8xf32>
    %cst_45 = arith.constant dense<0.000000e+00> : vector<8xf32>
    %151 = vector.multi_reduction <add>, %150, %cst_45 [1] : vector<8x8xf32> to vector<8xf32>
    %152 = vector.shape_cast %151 : vector<8xf32> to vector<8x1xf32>
    %153 = tpu.reciprocal %152 : vector<8x1xf32> -> vector<8x1xf32>
    %154 = vector.broadcast %153 : vector<8x1xf32> to vector<8x8xf32>
    %155 = arith.mulf %150, %154 : vector<8x8xf32>
    %cst_46 = arith.constant dense<0.000000e+00> : vector<8x8xf32>
    %156 = tpu.matmul %155, %141, %cst_46 {dimension_numbers = #tpu.dot_dimension_numbers<[1], [0], [0], [1], [0, 0, 1, 1], [], []>} : vector<8x8xf32>, vector<8x8xf32>, vector<8x8xf32> -> vector<8x8xf32>
    %157 = vector.extract_strided_slice %27 {offsets = [8, 24], sizes = [8, 8], strides = [1, 1]} : vector<16x32xf32> to vector<8x8xf32>
    %158 = vector.extract_strided_slice %28 {offsets = [8, 24], sizes = [8, 8], strides = [1, 1]} : vector<16x32xf32> to vector<8x8xf32>
    %159 = vector.extract_strided_slice %29 {offsets = [8, 24], sizes = [8, 8], strides = [1, 1]} : vector<16x32xf32> to vector<8x8xf32>
    %160 = tpu.transpose %158, [1, 0] : vector<8x8xf32> -> vector<8x8xf32>
    %cst_47 = arith.constant dense<0.000000e+00> : vector<8x8xf32>
    %161 = tpu.matmul %157, %160, %cst_47 {dimension_numbers = #tpu.dot_dimension_numbers<[1], [0], [0], [1], [0, 0, 1, 1], [], []>} : vector<8x8xf32>, vector<8x8xf32>, vector<8x8xf32> -> vector<8x8xf32>
    %cst_48 = arith.constant 0.353553385 : f32
    %162 = vector.broadcast %cst_48 : f32 to vector<8x8xf32>
    %163 = arith.mulf %161, %162 : vector<8x8xf32>
    %cst_49 = arith.constant dense<0xFF800000> : vector<8xf32>
    %164 = vector.multi_reduction <maximumf>, %163, %cst_49 [1] : vector<8x8xf32> to vector<8xf32>
    %165 = vector.shape_cast %164 : vector<8xf32> to vector<8x1xf32>
    %166 = vector.broadcast %165 : vector<8x1xf32> to vector<8x8xf32>
    %167 = arith.subf %163, %166 : vector<8x8xf32>
    %168 = math.exp %167 : vector<8x8xf32>
    %cst_50 = arith.constant dense<0.000000e+00> : vector<8xf32>
    %169 = vector.multi_reduction <add>, %168, %cst_50 [1] : vector<8x8xf32> to vector<8xf32>
    %170 = vector.shape_cast %169 : vector<8xf32> to vector<8x1xf32>
    %171 = tpu.reciprocal %170 : vector<8x1xf32> -> vector<8x1xf32>
    %172 = vector.broadcast %171 : vector<8x1xf32> to vector<8x8xf32>
    %173 = arith.mulf %168, %172 : vector<8x8xf32>
    %cst_51 = arith.constant dense<0.000000e+00> : vector<8x8xf32>
    %174 = tpu.matmul %173, %159, %cst_51 {dimension_numbers = #tpu.dot_dimension_numbers<[1], [0], [0], [1], [0, 0, 1, 1], [], []>} : vector<8x8xf32>, vector<8x8xf32>, vector<8x8xf32> -> vector<8x8xf32>
    %175 = tpu.concatenate %120, %138, %156, %174 in 1 : vector<8x8xf32>, vector<8x8xf32>, vector<8x8xf32>, vector<8x8xf32> -> vector<8x32xf32>
    %176 = tpu.concatenate %102, %175 in 0 : vector<8x32xf32>, vector<8x32xf32> -> vector<16x32xf32>
    %c0_52 = arith.constant 0 : index
    %c0_53 = arith.constant 0 : index
    %177 = vector.load %arg5[%c0_52, %c0_53] : memref<1x32xf32, #tpu.memory_space<vmem>>, vector<1x32xf32>
    %c0_54 = arith.constant 0 : index
    %c0_55 = arith.constant 0 : index
    %178 = vector.load %arg6[%c0_54, %c0_55] : memref<1x32xf32, #tpu.memory_space<vmem>>, vector<1x32xf32>
    %cst_56 = arith.constant dense<0.000000e+00> : vector<16xf32>
    %179 = vector.multi_reduction <add>, %176, %cst_56 [1] : vector<16x32xf32> to vector<16xf32>
    %180 = vector.shape_cast %179 : vector<16xf32> to vector<16x1xf32>
    %cst_57 = arith.constant 3.200000e+01 : f32
    %181 = vector.broadcast %cst_57 : f32 to vector<16x1xf32>
    %182 = arith.divf %180, %181 : vector<16x1xf32>
    %183 = vector.broadcast %182 : vector<16x1xf32> to vector<16x32xf32>
    %184 = arith.subf %176, %183 : vector<16x32xf32>
    %185 = arith.mulf %184, %184 : vector<16x32xf32>
    %cst_58 = arith.constant dense<0.000000e+00> : vector<16xf32>
    %186 = vector.multi_reduction <add>, %185, %cst_58 [1] : vector<16x32xf32> to vector<16xf32>
    %187 = vector.shape_cast %186 : vector<16xf32> to vector<16x1xf32>
    %cst_59 = arith.constant 3.200000e+01 : f32
    %188 = vector.broadcast %cst_59 : f32 to vector<16x1xf32>
    %189 = arith.divf %187, %188 : vector<16x1xf32>
    %190 = vector.broadcast %182 : vector<16x1xf32> to vector<16x32xf32>
    %191 = arith.subf %176, %190 : vector<16x32xf32>
    %cst_60 = arith.constant 9.99999974E-6 : f32
    %192 = vector.broadcast %cst_60 : f32 to vector<16x1xf32>
    %193 = arith.addf %189, %192 : vector<16x1xf32>
    %194 = math.rsqrt %193 : vector<16x1xf32>
    %195 = vector.broadcast %194 : vector<16x1xf32> to vector<16x32xf32>
    %196 = arith.mulf %191, %195 : vector<16x32xf32>
    %197 = vector.broadcast %177 : vector<1x32xf32> to vector<16x32xf32>
    %198 = arith.mulf %196, %197 : vector<16x32xf32>
    %199 = vector.broadcast %178 : vector<1x32xf32> to vector<16x32xf32>
    %200 = arith.addf %198, %199 : vector<16x32xf32>
    %c0_61 = arith.constant 0 : index
    %c0_62 = arith.constant 0 : index
    %201 = vector.load %arg7[%c0_61, %c0_62] : memref<32x32xf32, #tpu.memory_space<vmem>>, vector<32x32xf32>
    %cst_63 = arith.constant dense<0.000000e+00> : vector<16x32xf32>
    %202 = tpu.matmul %200, %201, %cst_63 {dimension_numbers = #tpu.dot_dimension_numbers<[1], [0], [0], [1], [0, 0, 1, 1], [], []>} : vector<16x32xf32>, vector<32x32xf32>, vector<16x32xf32> -> vector<16x32xf32>
    %c0_64 = arith.constant 0 : index
    %c0_65 = arith.constant 0 : index
    %203 = vector.load %arg8[%c0_64, %c0_65] : memref<1x32xf32, #tpu.memory_space<vmem>>, vector<1x32xf32>
    %204 = vector.broadcast %203 : vector<1x32xf32> to vector<16x32xf32>
    %205 = arith.addf %202, %204 : vector<16x32xf32>
    %206 = arith.addf %0, %205 : vector<16x32xf32>
    %c0_66 = arith.constant 0 : index
    %c0_67 = arith.constant 0 : index
    %207 = vector.load %arg9[%c0_66, %c0_67] : memref<1x32xf32, #tpu.memory_space<vmem>>, vector<1x32xf32>
    %c0_68 = arith.constant 0 : index
    %c0_69 = arith.constant 0 : index
    %208 = vector.load %arg10[%c0_68, %c0_69] : memref<1x32xf32, #tpu.memory_space<vmem>>, vector<1x32xf32>
    %cst_70 = arith.constant dense<0.000000e+00> : vector<16xf32>
    %209 = vector.multi_reduction <add>, %206, %cst_70 [1] : vector<16x32xf32> to vector<16xf32>
    %210 = vector.shape_cast %209 : vector<16xf32> to vector<16x1xf32>
    %cst_71 = arith.constant 3.200000e+01 : f32
    %211 = vector.broadcast %cst_71 : f32 to vector<16x1xf32>
    %212 = arith.divf %210, %211 : vector<16x1xf32>
    %213 = vector.broadcast %212 : vector<16x1xf32> to vector<16x32xf32>
    %214 = arith.subf %206, %213 : vector<16x32xf32>
    %215 = arith.mulf %214, %214 : vector<16x32xf32>
    %cst_72 = arith.constant dense<0.000000e+00> : vector<16xf32>
    %216 = vector.multi_reduction <add>, %215, %cst_72 [1] : vector<16x32xf32> to vector<16xf32>
    %217 = vector.shape_cast %216 : vector<16xf32> to vector<16x1xf32>
    %cst_73 = arith.constant 3.200000e+01 : f32
    %218 = vector.broadcast %cst_73 : f32 to vector<16x1xf32>
    %219 = arith.divf %217, %218 : vector<16x1xf32>
    %220 = vector.broadcast %212 : vector<16x1xf32> to vector<16x32xf32>
    %221 = arith.subf %206, %220 : vector<16x32xf32>
    %cst_74 = arith.constant 9.99999974E-6 : f32
    %222 = vector.broadcast %cst_74 : f32 to vector<16x1xf32>
    %223 = arith.addf %219, %222 : vector<16x1xf32>
    %224 = math.rsqrt %223 : vector<16x1xf32>
    %225 = vector.broadcast %224 : vector<16x1xf32> to vector<16x32xf32>
    %226 = arith.mulf %221, %225 : vector<16x32xf32>
    %227 = vector.broadcast %207 : vector<1x32xf32> to vector<16x32xf32>
    %228 = arith.mulf %226, %227 : vector<16x32xf32>
    %229 = vector.broadcast %208 : vector<1x32xf32> to vector<16x32xf32>
    %230 = arith.addf %228, %229 : vector<16x32xf32>
    %c0_75 = arith.constant 0 : index
    %c0_76 = arith.constant 0 : index
    %231 = vector.load %arg11[%c0_75, %c0_76] : memref<32x128xf32, #tpu.memory_space<vmem>>, vector<32x128xf32>
    %cst_77 = arith.constant dense<0.000000e+00> : vector<16x128xf32>
    %232 = tpu.matmul %230, %231, %cst_77 {dimension_numbers = #tpu.dot_dimension_numbers<[1], [0], [0], [1], [0, 0, 1, 1], [], []>} : vector<16x32xf32>, vector<32x128xf32>, vector<16x128xf32> -> vector<16x128xf32>
    %c0_78 = arith.constant 0 : index
    %c0_79 = arith.constant 0 : index
    %233 = vector.load %arg12[%c0_78, %c0_79] : memref<1x128xf32, #tpu.memory_space<vmem>>, vector<1x128xf32>
    %234 = vector.broadcast %233 : vector<1x128xf32> to vector<16x128xf32>
    %235 = arith.addf %232, %234 : vector<16x128xf32>
    %236 = arith.mulf %235, %235 : vector<16x128xf32>
    %237 = arith.mulf %236, %235 : vector<16x128xf32>
    %cst_80 = arith.constant 5.000000e-01 : f32
    %238 = vector.broadcast %cst_80 : f32 to vector<16x128xf32>
    %239 = arith.mulf %238, %235 : vector<16x128xf32>
    %cst_81 = arith.constant 4.471500e-02 : f32
    %240 = vector.broadcast %cst_81 : f32 to vector<16x128xf32>
    %241 = arith.mulf %240, %237 : vector<16x128xf32>
    %242 = arith.addf %235, %241 : vector<16x128xf32>
    %cst_82 = arith.constant 0.797884583 : f32
    %243 = vector.broadcast %cst_82 : f32 to vector<16x128xf32>
    %244 = arith.mulf %243, %242 : vector<16x128xf32>
    %245 = math.tanh %244 : vector<16x128xf32>
    %cst_83 = arith.constant 1.000000e+00 : f32
    %246 = vector.broadcast %cst_83 : f32 to vector<16x128xf32>
    %247 = arith.addf %246, %245 : vector<16x128xf32>
    %248 = arith.mulf %239, %247 : vector<16x128xf32>
    %c0_84 = arith.constant 0 : index
    %c0_85 = arith.constant 0 : index
    %249 = vector.load %arg13[%c0_84, %c0_85] : memref<1x128xf32, #tpu.memory_space<vmem>>, vector<1x128xf32>
    %c0_86 = arith.constant 0 : index
    %c0_87 = arith.constant 0 : index
    %250 = vector.load %arg14[%c0_86, %c0_87] : memref<1x128xf32, #tpu.memory_space<vmem>>, vector<1x128xf32>
    %cst_88 = arith.constant dense<0.000000e+00> : vector<16xf32>
    %251 = vector.multi_reduction <add>, %248, %cst_88 [1] : vector<16x128xf32> to vector<16xf32>
    %252 = vector.shape_cast %251 : vector<16xf32> to vector<16x1xf32>
    %cst_89 = arith.constant 1.280000e+02 : f32
    %253 = vector.broadcast %cst_89 : f32 to vector<16x1xf32>
    %254 = arith.divf %252, %253 : vector<16x1xf32>
    %255 = vector.broadcast %254 : vector<16x1xf32> to vector<16x128xf32>
    %256 = arith.subf %248, %255 : vector<16x128xf32>
    %257 = arith.mulf %256, %256 : vector<16x128xf32>
    %cst_90 = arith.constant dense<0.000000e+00> : vector<16xf32>
    %258 = vector.multi_reduction <add>, %257, %cst_90 [1] : vector<16x128xf32> to vector<16xf32>
    %259 = vector.shape_cast %258 : vector<16xf32> to vector<16x1xf32>
    %cst_91 = arith.constant 1.280000e+02 : f32
    %260 = vector.broadcast %cst_91 : f32 to vector<16x1xf32>
    %261 = arith.divf %259, %260 : vector<16x1xf32>
    %262 = vector.broadcast %254 : vector<16x1xf32> to vector<16x128xf32>
    %263 = arith.subf %248, %262 : vector<16x128xf32>
    %cst_92 = arith.constant 9.99999974E-6 : f32
    %264 = vector.broadcast %cst_92 : f32 to vector<16x1xf32>
    %265 = arith.addf %261, %264 : vector<16x1xf32>
    %266 = math.rsqrt %265 : vector<16x1xf32>
    %267 = vector.broadcast %266 : vector<16x1xf32> to vector<16x128xf32>
    %268 = arith.mulf %263, %267 : vector<16x128xf32>
    %269 = vector.broadcast %249 : vector<1x128xf32> to vector<16x128xf32>
    %270 = arith.mulf %268, %269 : vector<16x128xf32>
    %271 = vector.broadcast %250 : vector<1x128xf32> to vector<16x128xf32>
    %272 = arith.addf %270, %271 : vector<16x128xf32>
    %c0_93 = arith.constant 0 : index
    %c0_94 = arith.constant 0 : index
    %273 = vector.load %arg15[%c0_93, %c0_94] : memref<128x32xf32, #tpu.memory_space<vmem>>, vector<128x32xf32>
    %cst_95 = arith.constant dense<0.000000e+00> : vector<16x32xf32>
    %274 = tpu.matmul %272, %273, %cst_95 {dimension_numbers = #tpu.dot_dimension_numbers<[1], [0], [0], [1], [0, 0, 1, 1], [], []>} : vector<16x128xf32>, vector<128x32xf32>, vector<16x32xf32> -> vector<16x32xf32>
    %c0_96 = arith.constant 0 : index
    %c0_97 = arith.constant 0 : index
    %275 = vector.load %arg16[%c0_96, %c0_97] : memref<1x32xf32, #tpu.memory_space<vmem>>, vector<1x32xf32>
    %276 = vector.broadcast %275 : vector<1x32xf32> to vector<16x32xf32>
    %277 = arith.addf %274, %276 : vector<16x32xf32>
    %278 = arith.addf %206, %277 : vector<16x32xf32>
    %c0_98 = arith.constant 0 : index
    %c0_99 = arith.constant 0 : index
    %279 = vector.load %arg17[%c0_98, %c0_99] : memref<16x32xf32, #tpu.memory_space<vmem>>, vector<16x32xf32>
    tpu.vector_store %arg17[%c0_98, %c0_99], %278 {strides = array<i32>} : memref<16x32xf32, #tpu.memory_space<vmem>>, vector<16x32xf32>,
    return
  }
  func.func @transform_0(%arg0: i32) -> (i32, i32) {
    %c0_i32 = arith.constant 0 : i32
    %c0_i32_0 = arith.constant 0 : i32
    %c0_i32_1 = arith.constant 0 : i32
    return %c0_i32, %c0_i32_0 : i32, i32
  }
  func.func @transform_1(%arg0: i32) -> (i32, i32) {
    %c0_i32 = arith.constant 0 : i32
    %c0_i32_0 = arith.constant 0 : i32
    %c0_i32_1 = arith.constant 0 : i32
    return %c0_i32, %c0_i32_0 : i32, i32
  }
  func.func @transform_2(%arg0: i32) -> (i32, i32) {
    %c0_i32 = arith.constant 0 : i32
    %c0_i32_0 = arith.constant 0 : i32
    %c0_i32_1 = arith.constant 0 : i32
    return %c0_i32, %c0_i32_0 : i32, i32
  }
  func.func @transform_3(%arg0: i32) -> (i32, i32) {
    %c0_i32 = arith.constant 0 : i32
    %c0_i32_0 = arith.constant 0 : i32
    %c0_i32_1 = arith.constant 0 : i32
    return %c0_i32, %c0_i32_0 : i32, i32
  }
  func.func @transform_4(%arg0: i32) -> (i32, i32) {
    %c0_i32 = arith.constant 0 : i32
    %c0_i32_0 = arith.constant 0 : i32
    %c0_i32_1 = arith.constant 0 : i32
    return %c0_i32, %c0_i32_0 : i32, i32
  }
  func.func @transform_5(%arg0: i32) -> (i32, i32) {
    %c0_i32 = arith.constant 0 : i32
    %c0_i32_0 = arith.constant 0 : i32
    %c0_i32_1 = arith.constant 0 : i32
    return %c0_i32, %c0_i32_0 : i32, i32
  }
  func.func @transform_6(%arg0: i32) -> (i32, i32) {
    %c0_i32 = arith.constant 0 : i32
    %c0_i32_0 = arith.constant 0 : i32
    %c0_i32_1 = arith.constant 0 : i32
    return %c0_i32, %c0_i32_0 : i32, i32
  }
  func.func @transform_7(%arg0: i32) -> (i32, i32) {
    %c0_i32 = arith.constant 0 : i32
    %c0_i32_0 = arith.constant 0 : i32
    %c0_i32_1 = arith.constant 0 : i32
    return %c0_i32, %c0_i32_0 : i32, i32
  }
  func.func @transform_8(%arg0: i32) -> (i32, i32) {
    %c0_i32 = arith.constant 0 : i32
    %c0_i32_0 = arith.constant 0 : i32
    %c0_i32_1 = arith.constant 0 : i32
    return %c0_i32, %c0_i32_0 : i32, i32
  }
  func.func @transform_9(%arg0: i32) -> (i32, i32) {
    %c0_i32 = arith.constant 0 : i32
    %c0_i32_0 = arith.constant 0 : i32
    %c0_i32_1 = arith.constant 0 : i32
    return %c0_i32, %c0_i32_0 : i32, i32
  }
  func.func @transform_10(%arg0: i32) -> (i32, i32) {
    %c0_i32 = arith.constant 0 : i32
    %c0_i32_0 = arith.constant 0 : i32
    %c0_i32_1 = arith.constant 0 : i32
    return %c0_i32, %c0_i32_0 : i32, i32
  }
  func.func @transform_11(%arg0: i32) -> (i32, i32) {
    %c0_i32 = arith.constant 0 : i32
    %c0_i32_0 = arith.constant 0 : i32
    %c0_i32_1 = arith.constant 0 : i32
    return %c0_i32, %c0_i32_0 : i32, i32
  }
  func.func @transform_12(%arg0: i32) -> (i32, i32) {
    %c0_i32 = arith.constant 0 : i32
    %c0_i32_0 = arith.constant 0 : i32
    %c0_i32_1 = arith.constant 0 : i32
    return %c0_i32, %c0_i32_0 : i32, i32
  }
  func.func @transform_13(%arg0: i32) -> (i32, i32) {
    %c0_i32 = arith.constant 0 : i32
    %c0_i32_0 = arith.constant 0 : i32
    %c0_i32_1 = arith.constant 0 : i32
    return %c0_i32, %c0_i32_0 : i32, i32
  }
  func.func @transform_14(%arg0: i32) -> (i32, i32) {
    %c0_i32 = arith.constant 0 : i32
    %c0_i32_0 = arith.constant 0 : i32
    %c0_i32_1 = arith.constant 0 : i32
    return %c0_i32, %c0_i32_0 : i32, i32
  }
  func.func @transform_15(%arg0: i32) -> (i32, i32) {
    %c0_i32 = arith.constant 0 : i32
    %c0_i32_0 = arith.constant 0 : i32
    %c0_i32_1 = arith.constant 0 : i32
    return %c0_i32, %c0_i32_0 : i32, i32
  }
  func.func @transform_16(%arg0: i32) -> (i32, i32) {
    %c0_i32 = arith.constant 0 : i32
    %c0_i32_0 = arith.constant 0 : i32
    %c0_i32_1 = arith.constant 0 : i32
    return %c0_i32, %c0_i32_0 : i32, i32
  }
}

</mosaic_0001>

<bundles_post_ra>
// kernel: tpu_custom_call.1
= control target key start
LH: loop header
LB: loop body
LE: loop exit
PB: predicated region body
PF: predicated region fallthrough
CT: control target
= control target key end

     0   :  { %s2827_s0 = inlined_call_operand.vmem [shape: f32[16,32], index: 0, kind: input, shape index: {}]   ;;  %s2828_s1 = inlined_call_operand.vmem [shape: f32[1,32], index: 1, kind: input, shape index: {}]   ;;  %s2829_s2 = inlined_call_operand.vmem [shape: f32[1,32], index: 2, kind: input, shape index: {}]   ;;  %s2830_s3 = inlined_call_operand.vmem [shape: f32[32,96], index: 3, kind: input, shape index: {}]   ;;  %s2831_s4 = inlined_call_operand.vmem [shape: f32[1,32], index: 4, kind: input, shape index: {}]   ;;  %s2832_s5 = inlined_call_operand.vmem [shape: f32[1,32], index: 5, kind: input, shape index: {}]   ;;  %s2833_s6 = inlined_call_operand.vmem [shape: f32[32,32], index: 6, kind: input, shape index: {}]   ;;  %s2834_s7 = inlined_call_operand.vmem [shape: f32[1,32], index: 7, kind: input, shape index: {}]   ;;  %s2835_s8 = inlined_call_operand.vmem [shape: f32[1,32], index: 8, kind: input, shape index: {}]   ;;  %s2836_s9 = inlined_call_operand.vmem [shape: f32[1,32], index: 9, kind: input, shape index: {}]   ;;  %s2837_s10 = inlined_call_operand.vmem [shape: f32[32,128], index: 10, kind: input, shape index: {}]   ;;  %s2838_s11 = inlined_call_operand.vmem [shape: f32[1,128], index: 11, kind: input, shape index: {}]   ;;  %s2839_s12 = inlined_call_operand.vmem [shape: f32[1,128], index: 12, kind: input, shape index: {}]   ;;  %s2840_s13 = inlined_call_operand.vmem [shape: f32[1,128], index: 13, kind: input, shape index: {}]   ;;  %s2841_s14 = inlined_call_operand.vmem [shape: f32[128,32], index: 14, kind: input, shape index: {}]   ;;  %s2842_s15 = inlined_call_operand.vmem [shape: f32[1,32], index: 15, kind: input, shape index: {}]   ;;  %s2843_s16 = inlined_call_operand.hbm [shape: f32[16,32], index: 16, kind: output, shape index: {}]  }
   0x1   :  { %2845 = sst [smem:[#allocation5_spill]] %s2827_s0 }
   0x2   :  { %s2846_s23 = sld [smem:[#allocation5_spill]]  ;;  %vm58_vm0 = vcmask 261120  }
   0x8   :  { %v2510_v0 = vld [vmem:[%s2846_s23] sm:$0xff]  ;;  %v2515_v1 = vld [vmem:[%s2846_s23 + $0x8] sm:$0xff] }
   0x9   :  { %21 = vsyncpa [#allocation3], 0  ;;  %v59_v2 = vsel %vm58_vm0, %v2510_v0, 0.0  ;;  %v62_v3 = vsel %vm58_vm0, %v2515_v1, 0.0  ;;  %v102_v14 = vld [vmem:[%s2830_s3] sm:$0xff]  ;;  %v103_v15 = vld [vmem:[%s2830_s3 + $0x8] sm:$0xff] }
   0xa   :  { %60 = vadd.xlane.f32.xlu0 %v59_v2  ;;  %v104_v16 = vld [vmem:[%s2830_s3 + $0x10] sm:$0xff]  ;;  %v2254_v17 = vpack.c.bf16 %v103_v15, %v102_v14  ;;  %v105_v18 = vld [vmem:[%s2830_s3 + $0x18] sm:$0xff]  ;;  %v1997_v27 = vld [vmem:[%s2828_s1] ss:$0 sm:$0xff]  ;;  %v2404_v36 = vmov 0.0   ;;  %vm2405_vm1 = vmmov 0  }
   0xb   :  { %v2258_v19 = vpack.c.bf16 %v105_v18, %v104_v16  ;;  %v1998_v29 = vld [vmem:[%s2829_s2] ss:$0 sm:$0xff]  ;;  %2127 = vmatprep.subr.mxu0 %v2404_v36  ;;  %2129 = vmatprep.mubr.msk.f32.mxu0 %vm2405_vm1, %v2404_v36  ;;  %s2406_s1 = smov 88   ;;  %s2407_s2 = smov 96   ;;  %vm190_vm2 = vcmask 64512   ;;  %vm864_vm3 = vcmask 130048  }
   0xc   :  { %2255 = vmatprep.subr.bf16.mxu1 %v2254_v17  ;;  %s2408_s22 = smov 120   ;;  %s2409_s23 = smov 112   ;;  %vm866_vm4 = vcmask 195584  }
   0xd   :  { %2257 = vmatpush3.bf16.msra.mxu1 %v2254_v17  ;;  %s2410_s24 = smov 80   ;;  %s2411_s25 = smov 104  }
   0xe   :  { %63 = vadd.xlane.f32.xlu0 %v62_v3  ;;  %2259 = vmatprep.subr.bf16.mxu1 %v2258_v19  ;;  %s2412_s26 = smov 72   ;;  %s2413_s27 = smov 64  }
   0xf   :  { %s2414_s28 = smov 48   ;;  %s2415_s29 = smov 40  }
  0x10   :  { %s2416_s30 = smov 56   ;;  %s2417_s0 = smov 8  }
  0x11   :  { %2261 = vmatpush3.bf16.msra.mxu1 %v2258_v19  ;;  %s2418_s17 = smov 16   ;;  %s2419_s18 = smov 24  }
  0x12   :  { %2117 = vmatprep.subr.mxu1 %v2404_v36 }
  0x97   :  { %v61_v4 = vpop.xlane.xlu0 %60 }
  0x98   :  { %v66_v5 = vmul.f32 0.03125, %v61_v4 }
  0x9a   :  { %v68_v6 = vsub.f32 %v2510_v0, %v66_v5 }
  0x9b   :  { %v64_v7 = vpop.xlane.xlu0 %63 }
  0x9c   :  { %v67_v8 = vmul.f32 0.03125, %v64_v7  ;;  %v70_v9 = vmul.f32 %v68_v6, %v68_v6 }
  0x9e   :  { %v69_v10 = vsub.f32 %v2515_v1, %v67_v8  ;;  %v72_v11 = vsel %vm58_vm0, %v70_v9, 0.0 }
  0x9f   :  { %73 = vadd.xlane.f32.xlu1 %v72_v11 }
  0xa0   :  { %v71_v12 = vmul.f32 %v69_v10, %v69_v10 }
  0xa2   :  { %v75_v13 = vsel %vm58_vm0, %v71_v12, 0.0 }
  0xa3   :  { %76 = vadd.xlane.f32.xlu1 %v75_v13 }
 0x12c   :  { %v74_v20 = vpop.xlane.xlu1 %73 }
 0x12d   :  { %v78_v21 = vmul.f32 0.03125, %v74_v20 }
 0x12f   :  { %v80_v22 = vadd.f32 1e-05, %v78_v21 }
 0x130   :  { %v77_v23 = vpop.xlane.xlu1 %76 }
 0x131   :  { %2328 = vrsqrt.f32 %v80_v22  ;;  %v79_v24 = vmul.f32 0.03125, %v77_v23 }
 0x133   :  { %v81_v25 = vadd.f32 1e-05, %v79_v24 }
 0x135   :  { %2330 = vrsqrt.f32 %v81_v25 }
 0x13b   :  { %v2329_v26 = vpop.eup %2328 }
 0x13c   :  { %v84_v28 = vmul.f32 %v2329_v26, %v68_v6 }
 0x13e   :  { %v92_v30 = vmul.f32 %v1997_v27, %v84_v28 }
 0x13f   :  { %v2331_v31 = vpop.eup %2330 }
 0x140   :  { %v85_v32 = vmul.f32 %v2331_v31, %v69_v10  ;;  %v100_v33 = vadd.f32 %v1998_v29, %v92_v30 }
 0x142   :  { %v93_v34 = vmul.f32 %v1997_v27, %v85_v32  ;;  %2114 = vmatprep.mubr.msk.f32.mxu1 %vm58_vm0, %v100_v33 }
 0x144   :  { %v101_v35 = vadd.f32 %v1998_v29, %v93_v34 }
 0x146   :  { %2115 = vmatmul.mubr.msk.f32.vlgmr.msra.gmra.mrb[0].mxu1 %vm58_vm0, %v101_v35 }
 0x147   :  { %2119 = vmatprep.mubr.msk.f32.mxu1 %vm2405_vm1, %v2404_v36 }
 0x219   :  { %v2551_v37 = vpop.f32.mrb[0].mxu1 }
 0x21a   :  { %v2553_v38 = vpop.f32.mrb[1].mxu1 }
 0x21b   :  { %355 = vrot.lane.b32.xlu1 %v2553_v38, %s2406_s1  ;;  %188 = vrot.lane.b32.xlu0 %v2553_v38, %s2407_s2 }
 0x21f   :  { %353 = vrot.lane.b32.xlu1 %v2553_v38, %s2408_s22  ;;  %519 = vrot.lane.b32.xlu0 %v2553_v38, %s2409_s23 }
 0x223   :  { %521 = vrot.lane.b32.xlu1 %v2553_v38, %s2410_s24  ;;  %685 = vrot.lane.b32.xlu0 %v2553_v38, %s2411_s25 }
 0x227   :  { %687 = vrot.lane.b32.xlu1 %v2553_v38, %s2412_s26  ;;  %1035 = vrot.lane.b32.xlu0 %v2551_v37, %s2406_s1 }
 0x22b   :  { %869 = vrot.lane.b32.xlu1 %v2551_v37, %s2407_s2  ;;  %1201 = vrot.lane.b32.xlu0 %v2551_v37, %s2410_s24 }
 0x22f   :  { %1033 = vrot.lane.b32.xlu1 %v2551_v37, %s2408_s22  ;;  %1367 = vrot.lane.b32.xlu0 %v2551_v37, %s2412_s26 }
 0x233   :  { %1199 = vrot.lane.b32.xlu1 %v2551_v37, %s2409_s23 }
 0x237   :  { %1365 = vrot.lane.b32.xlu1 %v2551_v37, %s2411_s25 }
 0x28d   :  { %v356_v39 = vpop.permute.xlu1 %355  ;;  %v189_v40 = vpop.permute.xlu0 %188 }
 0x28e   :  { %2118 = vmatpush3.xpose.msk.msra.mxu1 %vm190_vm2, %v189_v40  ;;  %2128 = vmatpush3.xpose.msk.msra.mxu0 %vm190_vm2, %v356_v39 }
 0x28f   :  { %2137 = vmatprep.subr.mxu0 %v2404_v36  ;;  %2122 = vmatprep.subr.mxu1 %v2404_v36 }
 0x291   :  { %v354_v41 = vpop.permute.xlu1 %353  ;;  %2120 = vmatmul.mubr.msk.f32.vlgmr.msra.gmra.mrb[2].mxu1 %vm190_vm2, %v2553_v38  ;;  %v520_v42 = vpop.permute.xlu0 %519 }
 0x292   :  { %2130 = vmatmul.mubr.msk.f32.vlgmr.msra.gmra.mrb[0].mxu0 %vm190_vm2, %v354_v41  ;;  %2124 = vmatprep.mubr.msk.f32.mxu1 %vm2405_vm1, %v2404_v36 }
 0x293   :  { %2139 = vmatprep.mubr.msk.f32.mxu0 %vm2405_vm1, %v2404_v36 }
 0x295   :  { %v522_v43 = vpop.permute.xlu1 %521  ;;  %v686_v44 = vpop.permute.xlu0 %685 }
 0x296   :  { %2138 = vmatpush3.xpose.msk.msra.mxu0 %vm190_vm2, %v522_v43 }
 0x297   :  { %2147 = vmatprep.subr.mxu0 %v2404_v36 }
 0x299   :  { %v688_v45 = vpop.permute.xlu1 %687  ;;  %2140 = vmatmul.mubr.msk.f32.vlgmr.msra.gmra.mrb[2].mxu0 %vm190_vm2, %v520_v42  ;;  %v1036_v46 = vpop.permute.xlu0 %1035 }
 0x29a   :  { %2148 = vmatpush3.xpose.msk.msra.mxu0 %vm190_vm2, %v688_v45  ;;  %2149 = vmatprep.mubr.msk.f32.mxu0 %vm2405_vm1, %v2404_v36 }
 0x29b   :  { %2157 = vmatprep.subr.mxu0 %v2404_v36 }
 0x29d   :  { %v870_v47 = vpop.permute.xlu1 %869  ;;  %2150 = vmatmul.mubr.msk.f32.vlgmr.msra.gmra.mrb[4].mxu0 %vm190_vm2, %v686_v44  ;;  %v1202_v49 = vpop.permute.xlu0 %1201 }
 0x29e   :  { %2158 = vmatpush3.xpose.msk.msra.mxu0 %vm190_vm2, %v870_v47  ;;  %2159 = vmatprep.mubr.msk.f32.mxu0 %vm2405_vm1, %v2404_v36 }
 0x29f   :  { %2167 = vmatprep.subr.mxu0 %v2404_v36 }
 0x2a1   :  { %v1034_v48 = vpop.permute.xlu1 %1033  ;;  %2160 = vmatmul.mubr.msk.f32.vlgmr.msra.gmra.mrb[6].mxu0 %vm190_vm2, %v2551_v37  ;;  %v1368_v51 = vpop.permute.xlu0 %1367 }
 0x2a2   :  { %2168 = vmatpush3.xpose.msk.msra.mxu0 %vm190_vm2, %v1036_v46  ;;  %2169 = vmatprep.mubr.msk.f32.mxu0 %vm2405_vm1, %v2404_v36 }
 0x2a3   :  { %2177 = vmatprep.subr.mxu0 %v2404_v36 }
 0x2a5   :  { %2170 = vmatmul.mubr.msk.f32.vlgmr.msra.gmra.mrb[8].mxu0 %vm190_vm2, %v1034_v48  ;;  %v1200_v50 = vpop.permute.xlu1 %1199 }
 0x2a6   :  { %2178 = vmatpush3.xpose.msk.msra.mxu0 %vm190_vm2, %v1202_v49  ;;  %2179 = vmatprep.mubr.msk.f32.mxu0 %vm2405_vm1, %v2404_v36 }
 0x2a7   :  { %2187 = vmatprep.subr.mxu0 %v2404_v36 }
 0x2a9   :  { %2180 = vmatmul.mubr.msk.f32.vlgmr.msra.gmra.mrb[10].mxu0 %vm190_vm2, %v1200_v50  ;;  %v1366_v52 = vpop.permute.xlu1 %1365 }
 0x2aa   :  { %2188 = vmatpush3.xpose.msk.msra.mxu0 %vm190_vm2, %v1368_v51  ;;  %2189 = vmatprep.mubr.msk.f32.mxu0 %vm2405_vm1, %v2404_v36 }
 0x2ad   :  { %2190 = vmatmul.mubr.msk.f32.vlgmr.msra.gmra.mrb[12].mxu0 %vm190_vm2, %v1366_v52 }
 0x364   :  { %v261_v53 = vpop.f32.mrb[2].mxu1 }
 0x365   :  { %v265_v54 = vmul.f32 0.35355338, %v261_v53  ;;  %v2121_v55 = vpop.f32.mrb[3].mxu1  ;;  %v427_v56 = vpop.f32.mrb[0].mxu0 }
 0x366   :  { %v431_v57 = vmul.f32 0.35355338, %v427_v56  ;;  %v2131_v58 = vpop.f32.mrb[1].mxu0 }
 0x367   :  { %v266_v59 = vsel %vm190_vm2, %v265_v54, -inf }
 0x368   :  { %267 = vmax.xlane.f32.xlu0 %v266_v59  ;;  %v432_v60 = vsel %vm190_vm2, %v431_v57, -inf }
 0x369   :  { %433 = vmax.xlane.f32.xlu1 %v432_v60 }
 0x36c   :  { %v593_v61 = vpop.f32.mrb[2].mxu0 }
 0x36d   :  { %v2610_v62 = vmul.f32 0.35355338, %v593_v61  ;;  %v2141_v63 = vpop.f32.mrb[3].mxu0 }
 0x36f   :  { %v598_v2 = vsel %vm190_vm2, %v2610_v62, -inf }
 0x370   :  { %599 = vmax.xlane.f32.xlu0 %v598_v2  ;;  %v759_v3 = vpop.f32.mrb[4].mxu0 }
 0x371   :  { %v763_v4 = vmul.f32 0.35355338, %v759_v3  ;;  %v2151_v5 = vpop.f32.mrb[5].mxu0 }
 0x373   :  { %v764_v6 = vsel %vm190_vm2, %v763_v4, -inf }
 0x374   :  { %765 = vmax.xlane.f32.xlu0 %v764_v6  ;;  %v941_v7 = vpop.f32.mrb[6].mxu0 }
 0x375   :  { %v945_v8 = vmul.f32 0.35355338, %v941_v7  ;;  %v2161_v9 = vpop.f32.mrb[7].mxu0 }
 0x377   :  { %v946_v10 = vsel %vm190_vm2, %v945_v8, -inf }
 0x378   :  { %947 = vmax.xlane.f32.xlu0 %v946_v10  ;;  %v1107_v11 = vpop.f32.mrb[8].mxu0 }
 0x379   :  { %v1111_v12 = vmul.f32 0.35355338, %v1107_v11  ;;  %v2171_v13 = vpop.f32.mrb[9].mxu0 }
 0x37b   :  { %v1112_v14 = vsel %vm190_vm2, %v1111_v12, -inf }
 0x37c   :  { %1113 = vmax.xlane.f32.xlu1 %v1112_v14  ;;  %v1273_v15 = vpop.f32.mrb[10].mxu0 }
 0x37d   :  { %v1277_v16 = vmul.f32 0.35355338, %v1273_v15  ;;  %v2181_v17 = vpop.f32.mrb[11].mxu0 }
 0x37f   :  { %v1278_v18 = vsel %vm190_vm2, %v1277_v16, -inf }
 0x380   :  { %1279 = vmax.xlane.f32.xlu0 %v1278_v18  ;;  %v1439_v19 = vpop.f32.mrb[12].mxu0 }
 0x381   :  { %v2191_v20 = vpop.f32.mrb[13].mxu0  ;;  %v1443_v21 = vmul.f32 0.35355338, %v1439_v19 }
 0x383   :  { %v1444_v22 = vsel %vm190_vm2, %v1443_v21, -inf }
 0x38d   :  { %277 = vrot.lane.b32.xlu1 %v2553_v38, %s2413_s27 }
 0x3b1   :  { %1445 = vmax.xlane.f32.xlu1 %v1444_v22 }
 0x3c2   :  { %609 = vrot.lane.b32.xlu1 %v2553_v38, %s2414_s28 }
 0x3c6   :  { %775 = vrot.lane.b32.xlu1 %v2553_v38, %s2415_s29 }
 0x3ca   :  { %957 = vrot.lane.b32.xlu1 %v2551_v37, %s2413_s27 }
 0x3f5   :  { %v268_v23 = vpop.xlane.xlu0 %267 }
 0x3f6   :  { %v269_v24 = vsub.f32 %v265_v54, %v268_v23  ;;  %v434_v25 = vpop.xlane.xlu1 %433 }
 0x3f7   :  { %v435_v26 = vsub.f32 %v431_v57, %v434_v25 }
 0x3f8   :  { %v270_v27 = vmul.f32 1.442695, %v269_v24 }
 0x3f9   :  { %v436_v28 = vmul.f32 1.442695, %v435_v26 }
 0x3fa   :  { %2332 = vpow2.f32 %v270_v27 }
 0x3fb   :  { %2334 = vpow2.f32 %v436_v28 }
 0x3fd   :  { %v600_v29 = vpop.xlane.xlu0 %599 }
 0x3fe   :  { %v601_v44 = vsub.f32 %v2610_v62, %v600_v29 }
 0x400   :  { %v602_v46 = vmul.f32 1.442695, %v601_v44 }
 0x401   :  { %v766_v30 = vpop.xlane.xlu0 %765 }
 0x402   :  { %v767_v31 = vsub.f32 %v763_v4, %v766_v30 }
 0x404   :  { %v2333_v32 = vpop.eup %2332  ;;  %v768_v33 = vmul.f32 1.442695, %v767_v31 }
 0x405   :  { %v2625_v34 = vpop.eup %2334  ;;  %v272_v35 = vsel %vm190_vm2, %v2333_v32, 0.0  ;;  %v948_v45 = vpop.xlane.xlu0 %947 }
 0x406   :  { %2336 = vpow2.f32 %v768_v33  ;;  %273 = vadd.xlane.f32.xlu0 %v272_v35  ;;  %v438_v39 = vsel %vm190_vm2, %v2625_v34, 0.0  ;;  %v949_v47 = vsub.f32 %v945_v8, %v948_v45 }
 0x407   :  { %439 = vadd.xlane.f32.xlu1 %v438_v39  ;;  %2338 = vpow2.f32 %v602_v46 }
 0x408   :  { %v950_v49 = vmul.f32 1.442695, %v949_v47 }
 0x409   :  { %v1114_v40 = vpop.xlane.xlu1 %1113 }
 0x40a   :  { %2340 = vpow2.f32 %v950_v49  ;;  %v1115_v51 = vsub.f32 %v1111_v12, %v1114_v40 }
 0x40c   :  { %v1116_v53 = vmul.f32 1.442695, %v1115_v51 }
 0x40d   :  { %v278_v41 = vpop.permute.xlu1 %277  ;;  %v1280_v48 = vpop.xlane.xlu0 %1279 }
 0x40e   :  { %2123 = vmatpush3.msra.mxu1 %v278_v41  ;;  %v1281_v50 = vsub.f32 %v1277_v16, %v1280_v48 }
 0x40f   :  { %2132 = vmatprep.subr.mxu1 %v2404_v36 }
 0x410   :  { %v2631_v42 = vpop.eup %2336  ;;  %v1282_v52 = vmul.f32 1.442695, %v1281_v50 }
 0x411   :  { %v770_v43 = vsel %vm190_vm2, %v2631_v42, 0.0  ;;  %v2339_v54 = vpop.eup %2338 }
 0x412   :  { %771 = vadd.xlane.f32.xlu1 %v770_v43  ;;  %2342 = vpow2.f32 %v1282_v52 }
 0x413   :  { %2344 = vpow2.f32 %v1116_v53 }
 0x414   :  { %v2341_v55 = vpop.eup %2340 }
 0x415   :  { %v952_v57 = vsel %vm190_vm2, %v2341_v55, 0.0 }
 0x41c   :  { %443 = vrot.lane.b32.xlu0 %v2553_v38, %s2416_s30  ;;  %v604_v38 = vsel %vm190_vm2, %v2339_v54, 0.0  ;;  %v2640_v58 = vpop.eup %2342 }
 0x41d   :  { %v1284_v61 = vsel %vm190_vm2, %v2640_v58, 0.0  ;;  %v2345_v62 = vpop.eup %2344 }
 0x41e   :  { %v1118_v63 = vsel %vm190_vm2, %v2345_v62, 0.0 }
 0x423   :  { %1123 = vrot.lane.b32.xlu1 %v2551_v37, %s2416_s30 }
 0x43b   :  { %605 = vadd.xlane.f32.xlu0 %v604_v38 }
 0x43e   :  { %v1446_v56 = vpop.xlane.xlu1 %1445 }
 0x43f   :  { %v1447_v59 = vsub.f32 %v1443_v21, %v1446_v56  ;;  %953 = vadd.xlane.f32.xlu0 %v952_v57 }
 0x441   :  { %v1448_v60 = vmul.f32 1.442695, %v1447_v59 }
 0x442   :  { %v610_v4 = vpop.permute.xlu1 %609 }
 0x443   :  { %2346 = vpow2.f32 %v1448_v60  ;;  %1285 = vadd.xlane.f32.xlu0 %v1284_v61 }
 0x446   :  { %v776_v5 = vpop.permute.xlu1 %775 }
 0x447   :  { %1119 = vadd.xlane.f32.xlu1 %v1118_v63 }
 0x44a   :  { %v958_v6 = vpop.permute.xlu1 %957 }
 0x44d   :  { %v2645_v2 = vpop.eup %2346 }
 0x44e   :  { %v1450_v3 = vsel %vm190_vm2, %v2645_v2, 0.0 }
 0x44f   :  { %1451 = vadd.xlane.f32.xlu0 %v1450_v3 }
 0x458   :  { %1455 = vrot.lane.b32.xlu1 %v2551_v37, %s2415_s29 }
 0x465   :  { %1289 = vrot.lane.b32.xlu0 %v2551_v37, %s2414_s28 }
 0x493   :  { %v274_v7 = vpop.xlane.xlu0 %273 }
 0x494   :  { %2348 = vrcp.f32 %v274_v7  ;;  %v440_v8 = vpop.xlane.xlu1 %439 }
 0x495   :  { %2350 = vrcp.f32 %v440_v8 }
 0x497   :  { %v444_v12 = vpop.permute.xlu0 %443 }
 0x49e   :  { %v2349_v9 = vpop.eup %2348 }
 0x49f   :  { %v276_v10 = vmul.f32 %v2349_v9, %v2333_v32  ;;  %v2351_v11 = vpop.eup %2350  ;;  %v772_v37 = vpop.xlane.xlu1 %771 }
 0x4a0   :  { %v442_v13 = vmul.f32 %v2351_v11, %v2625_v34 }
 0x4a1   :  { %2125 = vmatmul.mubr.msk.f32.vlgmr.msra.gmra.mrb[4].mxu1 %vm190_vm2, %v276_v10 }
 0x4a2   :  { %2133 = vmatpush3.msra.mxu1 %v444_v12  ;;  %2134 = vmatprep.mubr.msk.f32.mxu1 %vm2405_vm1, %v2404_v36 }
 0x4a3   :  { %2142 = vmatprep.subr.mxu1 %v2404_v36  ;;  %v1124_v16 = vpop.permute.xlu1 %1123 }
 0x4a5   :  { %2135 = vmatmul.mubr.msk.f32.vlgmr.msra.gmra.mrb[6].mxu1 %vm190_vm2, %v442_v13  ;;  %v1590_v13 = vld [vmem:[%s2833_s6] sm:$0xff] }
 0x4a6   :  { %2143 = vmatpush3.msra.mxu1 %v610_v4  ;;  %2144 = vmatprep.mubr.msk.f32.mxu1 %vm2405_vm1, %v2404_v36 }
 0x4a7   :  { %2152 = vmatprep.subr.mxu1 %v2404_v36 }
 0x4c8   :  { %v606_v14 = vpop.xlane.xlu0 %605 }
 0x4c9   :  { %2352 = vrcp.f32 %v606_v14 }
 0x4ca   :  { %2354 = vrcp.f32 %v772_v37  ;;  %v1591_v37 = vld [vmem:[%s2833_s6 + $0x8] sm:$0xff] }
 0x4cb   :  { %v2262_v14 = vpack.c.bf16 %v1591_v37, %v1590_v13 }
 0x4cc   :  { %v954_v15 = vpop.xlane.xlu0 %953 }
 0x4cd   :  { %2356 = vrcp.f32 %v954_v15  ;;  %v1592_v15 = vld [vmem:[%s2833_s6 + $0x10] sm:$0xff] }
 0x4d0   :  { %v1286_v19 = vpop.xlane.xlu0 %1285 }
 0x4d3   :  { %v2353_v17 = vpop.eup %2352 }
 0x4d4   :  { %v608_v18 = vmul.f32 %v2353_v17, %v2339_v54  ;;  %v1120_v20 = vpop.xlane.xlu1 %1119  ;;  %v2355_v21 = vpop.eup %2354 }
 0x4d5   :  { %2358 = vrcp.f32 %v1120_v20  ;;  %v774_v22 = vmul.f32 %v2355_v21, %v2631_v42 }
 0x4d6   :  { %2145 = vmatmul.mubr.msk.f32.vlgmr.msra.gmra.mrb[8].mxu1 %vm190_vm2, %v608_v18  ;;  %2360 = vrcp.f32 %v1286_v19 }
 0x4d7   :  { %2153 = vmatpush3.msra.mxu1 %v776_v5  ;;  %2154 = vmatprep.mubr.msk.f32.mxu1 %vm2405_vm1, %v2404_v36  ;;  %v2357_v23 = vpop.eup %2356 }
 0x4d8   :  { %2162 = vmatprep.subr.mxu1 %v2404_v36  ;;  %v956_v24 = vmul.f32 %v2357_v23, %v2341_v55  ;;  %v1456_v31 = vpop.permute.xlu1 %1455 }
 0x4da   :  { %2155 = vmatmul.mubr.msk.f32.vlgmr.msra.gmra.mrb[10].mxu1 %vm190_vm2, %v774_v22  ;;  %v2025_v22 = vld [vmem:[%s2831_s4] ss:$0 sm:$0xff] }
 0x4db   :  { %2163 = vmatpush3.msra.mxu1 %v958_v6  ;;  %2164 = vmatprep.mubr.msk.f32.mxu1 %vm2405_vm1, %v2404_v36 }
 0x4dc   :  { %v1452_v25 = vpop.xlane.xlu0 %1451  ;;  %2172 = vmatprep.subr.mxu1 %v2404_v36 }
 0x4dd   :  { %2362 = vrcp.f32 %v1452_v25 }
 0x4de   :  { %2165 = vmatmul.mubr.msk.f32.vlgmr.msra.gmra.mrb[12].mxu1 %vm190_vm2, %v956_v24 }
 0x4df   :  { %v2359_v26 = vpop.eup %2358  ;;  %2173 = vmatpush3.msra.mxu1 %v1124_v16  ;;  %2174 = vmatprep.mubr.msk.f32.mxu1 %vm2405_vm1, %v2404_v36  ;;  %v1593_v16 = vld [vmem:[%s2833_s6 + $0x18] sm:$0xff] }
 0x4e0   :  { %v1122_v27 = vmul.f32 %v2359_v26, %v2345_v62  ;;  %v1290_v28 = vpop.permute.xlu0 %1289  ;;  %2182 = vmatprep.subr.mxu1 %v2404_v36  ;;  %v2361_v29 = vpop.eup %2360  ;;  %v2266_v17 = vpack.c.bf16 %v1593_v16, %v1592_v15  ;;  %v2026_v26 = vld [vmem:[%s2832_s5] ss:$0 sm:$0xff] }
 0x4e1   :  { %v1288_v30 = vmul.f32 %v2361_v29, %v2640_v58 }
 0x4e2   :  { %2175 = vmatmul.mubr.msk.f32.vlgmr.msra.gmra.mrb[14].mxu1 %vm190_vm2, %v1122_v27 }
 0x4e3   :  { %2183 = vmatpush3.msra.mxu1 %v1290_v28  ;;  %2184 = vmatprep.mubr.msk.f32.mxu1 %vm2405_vm1, %v2404_v36 }
 0x4e4   :  { %2192 = vmatprep.subr.mxu1 %v2404_v36 }
 0x4e6   :  { %2185 = vmatmul.mubr.msk.f32.vlgmr.msra.gmra.mrb[16].mxu1 %vm190_vm2, %v1288_v30 }
 0x4e7   :  { %v2363_v32 = vpop.eup %2362  ;;  %2193 = vmatpush3.msra.mxu1 %v1456_v31  ;;  %2194 = vmatprep.mubr.msk.f32.mxu1 %vm2405_vm1, %v2404_v36 }
 0x4e8   :  { %v1454_v33 = vmul.f32 %v2363_v32, %v2645_v2  ;;  %2263 = vmatprep.subr.bf16.mxu1 %v2262_v14 }
 0x4ea   :  { %2195 = vmatmul.mubr.msk.f32.vlgmr.msra.gmra.mrb[18].mxu1 %vm190_vm2, %v1454_v33 }
 0x4eb   :  { %2265 = vmatpush3.bf16.msra.mxu1 %v2262_v14 }
 0x4ec   :  { %2267 = vmatprep.subr.bf16.mxu1 %v2266_v17 }
 0x4ef   :  { %2269 = vmatpush3.bf16.msra.mxu1 %v2266_v17 }
 0x574   :  { %v349_v34 = vpop.f32.mrb[4].mxu1 }
 0x575   :  { %v2126_v35 = vpop.f32.mrb[5].mxu1 }
 0x578   :  { %v515_v39 = vpop.f32.mrb[6].mxu1 }
 0x579   :  { %852 = vrot.lane.b32.xlu0 %v515_v39, %s2417_s0  ;;  %v2136_v40 = vpop.f32.mrb[7].mxu1 }
 0x5a9   :  { %v681_v41 = vpop.f32.mrb[8].mxu1 }
 0x5aa   :  { %856 = vrot.lane.b32.xlu1 %v681_v41, %s2418_s17  ;;  %v2146_v42 = vpop.f32.mrb[9].mxu1 }
 0x5ad   :  { %v847_v43 = vpop.f32.mrb[10].mxu1 }
 0x5ae   :  { %860 = vrot.lane.b32.xlu1 %v847_v43, %s2419_s18  ;;  %v2156_v44 = vpop.f32.mrb[11].mxu1 }
 0x5b1   :  { %v1029_v36 = vpop.f32.mrb[12].mxu1 }
 0x5b2   :  { %v2166_v45 = vpop.f32.mrb[13].mxu1 }
 0x5b5   :  { %v1195_v46 = vpop.f32.mrb[14].mxu1 }
 0x5b6   :  { %1532 = vrot.lane.b32.xlu0 %v1195_v46, %s2417_s0  ;;  %v2176_v47 = vpop.f32.mrb[15].mxu1 }
 0x5b9   :  { %v1361_v48 = vpop.f32.mrb[16].mxu1 }
 0x5ba   :  { %1536 = vrot.lane.b32.xlu0 %v1361_v48, %s2418_s17  ;;  %v2186_v49 = vpop.f32.mrb[17].mxu1 }
 0x5bd   :  { %v1527_v50 = vpop.f32.mrb[18].mxu1 }
 0x5be   :  { %1540 = vrot.lane.b32.xlu1 %v1527_v50, %s2419_s18  ;;  %v2196_v51 = vpop.f32.mrb[19].mxu1 }
 0x5eb   :  { %v853_v52 = vpop.permute.xlu0 %852 }
 0x5ec   :  { %v863_v54 = vsel %vm190_vm2, %v349_v34, %v853_v52  ;;  %v2027_v34 = vld [vmem:[%s2834_s7] ss:$0 sm:$0xff] }
 0x61c   :  { %v857_v53 = vpop.permute.xlu1 %856 }
 0x61d   :  { %v865_v38 = vsel %vm864_vm3, %v863_v54, %v857_v53  ;;  %v1728_v53 = vld [vmem:[%s2837_s10] sm:$0xff]  ;;  %v1729_v54 = vld [vmem:[%s2837_s10 + $0x8] sm:$0xff] }
 0x620   :  { %v861_v55 = vpop.permute.xlu1 %860 }
 0x621   :  { %v867_v56 = vsel %vm866_vm4, %v865_v38, %v861_v55  ;;  %v2270_v38 = vpack.c.bf16 %v1729_v54, %v1728_v53  ;;  %v1730_v55 = vld [vmem:[%s2837_s10 + $0x10] sm:$0xff]  ;;  %v1886_v54 = vld [vmem:[%s2841_s14 + $0x38] sm:$0xff] }
 0x622   :  { %v1548_v57 = vsel %vm58_vm0, %v867_v56, 0.0  ;;  %v1885_v53 = vld [vmem:[%s2841_s14 + $0x30] sm:$0xff] }
 0x623   :  { %1549 = vadd.xlane.f32.xlu0 %v1548_v57  ;;  %2271 = vmatprep.subr.bf16.mxu1 %v2270_v38 }
 0x628   :  { %v1533_v58 = vpop.permute.xlu0 %1532 }
 0x629   :  { %v1543_v60 = vsel %vm190_vm2, %v1029_v36, %v1533_v58 }
 0x62c   :  { %v1537_v59 = vpop.permute.xlu0 %1536 }
 0x62d   :  { %v1544_v61 = vsel %vm864_vm3, %v1543_v60, %v1537_v59 }
 0x630   :  { %v1541_v62 = vpop.permute.xlu1 %1540 }
 0x631   :  { %v1545_v63 = vsel %vm866_vm4, %v1544_v61, %v1541_v62 }
 0x632   :  { %v1551_v2 = vsel %vm58_vm0, %v1545_v63, 0.0 }
 0x633   :  { %1552 = vadd.xlane.f32.xlu1 %v1551_v2 }
 0x6b0   :  { %v1550_v3 = vpop.xlane.xlu0 %1549 }
 0x6b1   :  { %v1554_v4 = vmul.f32 0.03125, %v1550_v3  ;;  %v2030_v3 = vld [vmem:[%s2835_s8] ss:$0 sm:$0xff] }
 0x6b3   :  { %v1556_v5 = vsub.f32 %v867_v56, %v1554_v4  ;;  %v1731_v56 = vld [vmem:[%s2837_s10 + $0x18] sm:$0xff] }
 0x6b4   :  { %v2274_v57 = vpack.c.bf16 %v1731_v56, %v1730_v55  ;;  %v1887_v55 = vld [vmem:[%s2841_s14 + $0x40] sm:$0xff]  ;;  %v1888_v56 = vld [vmem:[%s2841_s14 + $0x48] sm:$0xff] }
 0x6b5   :  { %v1558_v6 = vmul.f32 %v1556_v5, %v1556_v5 }
 0x6b7   :  { %v1560_v7 = vsel %vm58_vm0, %v1558_v6, 0.0 }
 0x6b8   :  { %1561 = vadd.xlane.f32.xlu0 %v1560_v7  ;;  %v2031_v7 = vld [vmem:[%s2836_s9] ss:$0 sm:$0xff] }
 0x6c0   :  { %v1553_v8 = vpop.xlane.xlu1 %1552 }
 0x6c1   :  { %v1555_v9 = vmul.f32 0.03125, %v1553_v8 }
 0x6c3   :  { %v1557_v10 = vsub.f32 %v1545_v63, %v1555_v9 }
 0x6c5   :  { %v1559_v11 = vmul.f32 %v1557_v10, %v1557_v10 }
 0x6c7   :  { %v1563_v12 = vsel %vm58_vm0, %v1559_v11, 0.0 }
 0x6c8   :  { %1564 = vadd.xlane.f32.xlu0 %v1563_v12  ;;  %v2032_v12 = vld [vmem:[%s2838_s11] ss:$0 sm:$0xff] }
 0x745   :  { %v1562_v18 = vpop.xlane.xlu0 %1561 }
 0x746   :  { %v1566_v19 = vmul.f32 0.03125, %v1562_v18 }
 0x748   :  { %v1568_v20 = vadd.f32 1e-05, %v1566_v19 }
 0x74a   :  { %2364 = vrsqrt.f32 %v1568_v20 }
 0x754   :  { %v2365_v21 = vpop.eup %2364 }
 0x755   :  { %v1565_v23 = vpop.xlane.xlu0 %1564  ;;  %v1572_v24 = vmul.f32 %v2365_v21, %v1556_v5 }
 0x756   :  { %v1567_v25 = vmul.f32 0.03125, %v1565_v23 }
 0x757   :  { %v1580_v27 = vmul.f32 %v2025_v22, %v1572_v24 }
 0x758   :  { %v1569_v28 = vadd.f32 1e-05, %v1567_v25 }
 0x759   :  { %v1588_v29 = vadd.f32 %v2026_v26, %v1580_v27 }
 0x75a   :  { %2366 = vrsqrt.f32 %v1569_v28 }
 0x75b   :  { %2205 = vmatprep.mubr.msk.f32.mxu1 %vm58_vm0, %v1588_v29 }
 0x764   :  { %v2367_v30 = vpop.eup %2366 }
 0x765   :  { %v1573_v31 = vmul.f32 %v2367_v30, %v1557_v10 }
 0x767   :  { %v1581_v32 = vmul.f32 %v2025_v22, %v1573_v31 }
 0x769   :  { %v1589_v33 = vadd.f32 %v2026_v26, %v1581_v32 }
 0x76b   :  { %2206 = vmatmul.mubr.msk.f32.vlgmr.msra.gmra.mrb[20].mxu1 %vm58_vm0, %v1589_v33 }
 0x76c   :  { %2273 = vmatpush3.bf16.msra.mxu1 %v2270_v38  ;;  %v2290_v38 = vpack.c.bf16 %v1886_v54, %v1885_v53 }
 0x76d   :  { %2275 = vmatprep.subr.bf16.mxu1 %v2274_v57 }
 0x770   :  { %2277 = vmatpush3.bf16.msra.mxu1 %v2274_v57  ;;  %v1889_v57 = vld [vmem:[%s2841_s14 + $0x50] sm:$0xff] }
 0x83e   :  { %v2207_v35 = vpop.f32.mrb[20].mxu1 }
 0x83f   :  { %v1679_v39 = vadd.f32 %v2207_v35, %v2027_v34  ;;  %v1673_v40 = vpop.f32.mrb[21].mxu1  ;;  %v1880_v35 = vld [vmem:[%s2841_s14 + $0x8] sm:$0xff] }
 0x840   :  { %v1674_v41 = vadd.f32 %v2027_v34, %v1673_v40  ;;  %v1879_v34 = vld [vmem:[%s2841_s14] sm:$0xff] }
 0x841   :  { %v2717_v42 = vadd.f32 %v1679_v39, %v2515_v1  ;;  %v1881_v39 = vld [vmem:[%s2841_s14 + $0x10] sm:$0xff]  ;;  %v2278_v40 = vpack.c.bf16 %v1880_v35, %v1879_v34 }
 0x842   :  { %v2720_v43 = vadd.f32 %v1674_v41, %v2510_v0  ;;  %v1882_v41 = vld [vmem:[%s2841_s14 + $0x18] sm:$0xff] }
 0x843   :  { %v1689_v44 = vsel %vm58_vm0, %v2717_v42, 0.0  ;;  %2279 = vmatprep.subr.bf16.mxu0 %v2278_v40 }
 0x844   :  { %1690 = vadd.xlane.f32.xlu1 %v1689_v44  ;;  %v1686_v36 = vsel %vm58_vm0, %v2720_v43, 0.0  ;;  %v2282_v44 = vpack.c.bf16 %v1882_v41, %v1881_v39  ;;  %2281 = vmatpush3.bf16.msra.mxu0 %v2278_v40 }
 0x845   :  { %1687 = vadd.xlane.f32.xlu0 %v1686_v36  ;;  %v1883_v36 = vld [vmem:[%s2841_s14 + $0x20] sm:$0xff] }
 0x846   :  { %2283 = vmatprep.subr.bf16.mxu0 %v2282_v44 }
 0x848   :  { %2285 = vmatpush3.bf16.msra.mxu0 %v2282_v44 }
 0x8d1   :  { %v1691_v45 = vpop.xlane.xlu1 %1690 }
 0x8d2   :  { %v1693_v46 = vmul.f32 0.03125, %v1691_v45  ;;  %v1688_v47 = vpop.xlane.xlu0 %1687  ;;  %v1884_v45 = vld [vmem:[%s2841_s14 + $0x28] sm:$0xff] }
 0x8d3   :  { %v1692_v48 = vmul.f32 0.03125, %v1688_v47 }
 0x8d4   :  { %v1695_v49 = vsub.f32 %v2717_v42, %v1693_v46  ;;  %v2286_v46 = vpack.c.bf16 %v1884_v45, %v1883_v36 }
 0x8d5   :  { %v1694_v1 = vsub.f32 %v2720_v43, %v1692_v48 }
 0x8d6   :  { %v1697_v50 = vmul.f32 %v1695_v49, %v1695_v49  ;;  %2287 = vmatprep.subr.bf16.mxu0 %v2286_v46 }
 0x8d7   :  { %v1696_v51 = vmul.f32 %v1694_v1, %v1694_v1  ;;  %2289 = vmatpush3.bf16.msra.mxu0 %v2286_v46 }
 0x8d8   :  { %v1701_v0 = vsel %vm58_vm0, %v1697_v50, 0.0  ;;  %2291 = vmatprep.subr.bf16.mxu0 %v2290_v38 }
 0x8d9   :  { %1702 = vadd.xlane.f32.xlu1 %v1701_v0  ;;  %v1698_v52 = vsel %vm58_vm0, %v1696_v51, 0.0 }
 0x8da   :  { %1699 = vadd.xlane.f32.xlu0 %v1698_v52 }
 0x8db   :  { %2293 = vmatpush3.bf16.msra.mxu0 %v2290_v38 }
 0x966   :  { %v1703_v58 = vpop.xlane.xlu1 %1702 }
 0x967   :  { %v1705_v59 = vmul.f32 0.03125, %v1703_v58  ;;  %v1700_v60 = vpop.xlane.xlu0 %1699  ;;  %v2294_v58 = vpack.c.bf16 %v1888_v56, %v1887_v55 }
 0x968   :  { %v1704_v61 = vmul.f32 0.03125, %v1700_v60 }
 0x969   :  { %v1707_v62 = vadd.f32 1e-05, %v1705_v59  ;;  %v1890_v59 = vld [vmem:[%s2841_s14 + $0x58] sm:$0xff]  ;;  %2295 = vmatprep.subr.bf16.mxu0 %v2294_v58 }
 0x96a   :  { %v1706_v63 = vadd.f32 1e-05, %v1704_v61  ;;  %v2298_v60 = vpack.c.bf16 %v1890_v59, %v1889_v57  ;;  %v1891_v61 = vld [vmem:[%s2841_s14 + $0x60] sm:$0xff]  ;;  %2297 = vmatpush3.bf16.msra.mxu0 %v2294_v58 }
 0x96b   :  { %2368 = vrsqrt.f32 %v1707_v62  ;;  %v1892_v62 = vld [vmem:[%s2841_s14 + $0x68] sm:$0xff] }
 0x96c   :  { %2370 = vrsqrt.f32 %v1706_v63  ;;  %2299 = vmatprep.subr.bf16.mxu0 %v2298_v60  ;;  %v2302_v63 = vpack.c.bf16 %v1892_v62, %v1891_v61 }
 0x96e   :  { %2301 = vmatpush3.bf16.msra.mxu0 %v2298_v60 }
 0x96f   :  { %2303 = vmatprep.subr.bf16.mxu0 %v2302_v63 }
 0x972   :  { %2305 = vmatpush3.bf16.msra.mxu0 %v2302_v63 }
 0x975   :  { %v2369_v2 = vpop.eup %2368 }
 0x976   :  { %v2371_v4 = vpop.eup %2370  ;;  %v1711_v5 = vmul.f32 %v2369_v2, %v1695_v49  ;;  %v1893_v2 = vld [vmem:[%s2841_s14 + $0x70] sm:$0xff] }
 0x977   :  { %v1710_v6 = vmul.f32 %v2371_v4, %v1694_v1 }
 0x978   :  { %v1719_v8 = vmul.f32 %v2030_v3, %v1711_v5 }
 0x979   :  { %v1718_v9 = vmul.f32 %v2030_v3, %v1710_v6  ;;  %v1894_v3 = vld [vmem:[%s2841_s14 + $0x78] sm:$0xff] }
 0x97a   :  { %v1727_v11 = vadd.f32 %v2031_v7, %v1719_v8  ;;  %v2306_v4 = vpack.c.bf16 %v1894_v3, %v1893_v2 }
 0x97b   :  { %v1726_v10 = vadd.f32 %v2031_v7, %v1718_v9 }
 0x97c   :  { %2307 = vmatprep.subr.bf16.mxu0 %v2306_v4 }
 0x97d   :  { %2216 = vmatprep.mubr.msk.f32.mxu1 %vm58_vm0, %v1726_v10  ;;  %2309 = vmatpush3.bf16.msra.mxu0 %v2306_v4 }
 0x97e   :  { %2217 = vmatmul.mubr.msk.f32.vlgmr.msra.gmra.mrb[22].mxu1 %vm58_vm0, %v1727_v11 }
 0xa51   :  { %v2218_v13 = vpop.f32.mrb[22].mxu1 }
 0xa52   :  { %v1817_v37 = vadd.f32 %v2218_v13, %v2032_v12  ;;  %v1811_v14 = vpop.f32.mrb[23].mxu1 }
 0xa53   :  { %v1812_v15 = vadd.f32 %v2032_v12, %v1811_v14  ;;  %v2035_v12 = vld [vmem:[%s2839_s12] ss:$0 sm:$0xff]  ;;  %s2420_s12 = smov [#allocation2]  }
 0xa54   :  { %v1821_v16 = vmul.f32 %v1817_v37, %v1817_v37  ;;  %v1825_v28 = vmul.f32 0.5, %v1817_v37  ;;  %s1986_s7 = sshll.u32 %s2420_s12, 4  ;;  %s1987_s7 = int_to_ptr.vmem [resolvable:$true] %s1986_s7 }
 0xa55   :  { %v1820_v17 = vmul.f32 %v1812_v15, %v1812_v15  ;;  %v1824_v30 = vmul.f32 0.5, %v1812_v15  ;;  %p2385_p1 = scmp.lt.s32.totalorder %s1987_s7, %s1987_s7 }
 0xa56   :  { %v1823_v18 = vmul.f32 %v1821_v16, %v1817_v37 }
 0xa57   :  { %v1822_v19 = vmul.f32 %v1820_v17, %v1812_v15 }
 0xa58   :  { %v1827_v20 = vmul.f32 0.044715, %v1823_v18 }
 0xa59   :  { %v1826_v21 = vmul.f32 0.044715, %v1822_v19 }
 0xa5a   :  { %v1829_v22 = vadd.f32 %v1827_v20, %v1817_v37  ;;  %v2037_v20 = vld [vmem:[%s2842_s15] ss:$0 sm:$0xff] }
 0xa5b   :  { %v1828_v23 = vadd.f32 %v1826_v21, %v1812_v15  ;;  %v2036_v15 = vld [vmem:[%s2840_s13] ss:$0 sm:$0xff]  ;;  %s2380_s13 = scalar_lea.vmem %s1987_s7, 256 }
 0xa5c   :  { %v1831_v24 = vmul.f32 0.7978846, %v1829_v22  ;;  %p2381_p0 = scmp.ne.s32.totalorder %s1987_s7, %s2380_s13  ;;  %p2386_p2 = scmp.lt.s32.totalorder %s2380_s13, %s2380_s13 }
 0xa5d   :  { %v1830_v25 = vmul.f32 0.7978846, %v1828_v23 }
 0xa5e   :  { %2372 = vtanh.f32 %v1831_v24  ;;  %p2387_p3 = por %p2386_p2, %p2385_p1 }
 0xa5f   :  { %2374 = vtanh.f32 %v1830_v25 }
 0xa60   :  { %p2388_p4 = pnand %p2387_p3, %p2381_p0 }
 0xa68   :  { %v2373_v26 = vpop.eup %2372 }
 0xa69   :  { %v2375_v27 = vpop.eup %2374  ;;  %v1835_v29 = vadd.f32 1.0, %v2373_v26 }
 0xa6a   :  { %v1834_v31 = vadd.f32 1.0, %v2375_v27 }
 0xa6b   :  { %v1837_v32 = vmul.f32 %v1835_v29, %v1825_v28 }
 0xa6c   :  { %v1836_v33 = vmul.f32 %v1834_v31, %v1824_v30 }
 0xa6d   :  { %1842 = vadd.xlane.f32.xlu1 %v1837_v32 }
 0xa6e   :  { %1840 = vadd.xlane.f32.xlu0 %v1836_v33 }
 0xafa   :  { %v1843_v47 = vpop.xlane.xlu1 %1842 }
 0xafb   :  { %v1846_v48 = vmul.f32 0.0078125, %v1843_v47  ;;  %v1841_v49 = vpop.xlane.xlu0 %1840 }
 0xafc   :  { %v1845_v1 = vmul.f32 0.0078125, %v1841_v49 }
 0xafd   :  { %v1848_v50 = vsub.f32 %v1837_v32, %v1846_v48 }
 0xafe   :  { %v1847_v51 = vsub.f32 %v1836_v33, %v1845_v1 }
 0xaff   :  { %v1850_v0 = vmul.f32 %v1848_v50, %v1848_v50 }
 0xb00   :  { %v1849_v52 = vmul.f32 %v1847_v51, %v1847_v51 }
 0xb01   :  { %1853 = vadd.xlane.f32.xlu1 %v1850_v0 }
 0xb02   :  { %1851 = vadd.xlane.f32.xlu0 %v1849_v52 }
 0xb8e   :  { %v1854_v5 = vpop.xlane.xlu1 %1853 }
 0xb8f   :  { %v1856_v6 = vmul.f32 0.0078125, %v1854_v5  ;;  %v1852_v7 = vpop.xlane.xlu0 %1851 }
 0xb90   :  { %v1855_v8 = vmul.f32 0.0078125, %v1852_v7 }
 0xb91   :  { %v1858_v9 = vadd.f32 1e-05, %v1856_v6 }
 0xb92   :  { %v1857_v10 = vadd.f32 1e-05, %v1855_v8 }
 0xb93   :  { %2376 = vrsqrt.f32 %v1858_v9 }
 0xb94   :  { %2378 = vrsqrt.f32 %v1857_v10 }
 0xb9d   :  { %v2377_v11 = vpop.eup %2376 }
 0xb9e   :  { %v2379_v13 = vpop.eup %2378  ;;  %v1862_v37 = vmul.f32 %v2377_v11, %v1848_v50 }
 0xb9f   :  { %v1861_v14 = vmul.f32 %v2379_v13, %v1847_v51 }
 0xba0   :  { %v1870_v16 = vmul.f32 %v2035_v12, %v1862_v37 }
 0xba1   :  { %v1869_v17 = vmul.f32 %v2035_v12, %v1861_v14 }
 0xba2   :  { %v1878_v19 = vadd.f32 %v2036_v15, %v1870_v16 }
 0xba3   :  { %v1877_v18 = vadd.f32 %v2036_v15, %v1869_v17 }
 0xba5   :  { %2251 = vmatprep.mubr.f32.mxu0 %v1877_v18 }
 0xba6   :  { %2252 = vmatmul.mubr.f32.vlgmr.msra.gmra.mrb[14].mxu0 %v1878_v19 }
 0xc79   :  { %v2253_v21 = vpop.f32.mrb[14].mxu0 }
 0xc7a   :  { %v1974_v22 = vadd.f32 %v2253_v21, %v2037_v20  ;;  %v1968_v23 = vpop.f32.mrb[15].mxu0 }
 0xc7b   :  { %v1969_v24 = vadd.f32 %v2037_v20, %v1968_v23 }
 0xc7c   :  { %v1978_v25 = vadd.f32 %v1974_v22, %v2717_v42 }
 0xc7d   :  { %v1977_v26 = vadd.f32 %v1969_v24, %v2720_v43 }
 0xc7e   :  { %1980 = vst.msk [vmem:[#allocation2 + $0x8] sm:$0xff] %vm58_vm0, %v1978_v25 }
 0xc7f   :  { %1979 = vst.msk [vmem:[#allocation2] sm:$0xff] %vm58_vm0, %v1977_v26 }
 0xc80   :  { %2391 = shalt.err (!%p2388_p4)
}
 0xc81   :  { %s2392_s29 = scalar_lea.hbm %s2843_s16, 256 }
 0xc82   :  { %p2393_p5 = scmp.ne.s32.totalorder %s2843_s16, %s2392_s29  ;;  %p2396_p6 = scmp.lt.u32.totalorder %s2392_s29, %s2843_s16 }
 0xc84   :  { %p2398_p7 = pnand %p2396_p6, %p2393_p5 }
 0xc86   :  { %2401 = shalt.err (!%p2398_p7)
}
 0xc87   :  { %s2421_s20 = smov 128  }
 0xc88   :  { %1992 = dma.vmem_to_hbm [thread:$0]  %s1987_s7, 256, %s2843_s16, [#allocation3], %s2421_s20, %s2421_s20, %s2417_s0  }
 0xc89   :  { %2402 = dma.done.wait [#allocation3], 256  }
 0xc8a   :  { %2403 = vsyncadd [#allocation3], 4294967040 }
 0xc8b   :  { %1996 = vsyncpa [#allocation3], 1 }

</bundles_post_ra>
